<compile_context>
chip_gen: v7x
topology: tpu7x:2x2x1
jax: 0.10.0
libtpu: 0.0.40
codegen_flags: <defaults>
</compile_context>

<pallas_src>
import math
import functools

import jax
import jax.numpy as jnp
from jax import lax
from jax.experimental import pallas as pl
from jax.experimental.pallas import tpu as pltpu


_VMEM_LIMIT = 64 * 1024 * 1024   # <= physical VMEM on v5e/v6e (128MiB) & v7x (64MiB)


def _tile(n, candidates=(256, 128, 64, 32, 16, 8)):
    """Largest candidate that evenly divides n (falls back to n itself).

    256-first suits the 2x256^2 MXU of v6e/v7x; on v5e a 128-first list is
    equally good.  All candidates are sublane(8)-aligned.
    """
    for c in candidates:
        if n >= c and n % c == 0:
            return c
    return n


# ----------------------------------------------------------------------------
# Feature probe: single-buffered (grid-invariant) operands via pl.Buffered(1)
# ----------------------------------------------------------------------------
_SINGLE_BUFFER_OK = None


def _single_buffer_supported():
    global _SINGLE_BUFFER_OK
    if _SINGLE_BUFFER_OK is None:
        try:
            def _k(w_ref, o_ref):
                o_ref[...] = w_ref[...] * 2.0
            probe = pl.pallas_call(
                _k,
                out_shape=jax.ShapeDtypeStruct((8, 128), jnp.float32),
                grid=(2,),
                in_specs=[pl.BlockSpec((8, 128), lambda i: (0, 0),
                                       pipeline_mode=pl.Buffered(1))],
                out_specs=pl.BlockSpec((8, 128), lambda i: (0, 0)),
            )
            jax.block_until_ready(probe(jnp.ones((8, 128), jnp.float32)))
            _SINGLE_BUFFER_OK = True
        except Exception:           # older JAX: fall back to default buffering
            _SINGLE_BUFFER_OK = False
    return _SINGLE_BUFFER_OK


def _resident_spec(shape):
    """BlockSpec for a grid-invariant operand kept resident in VMEM.

    Single-buffered (no wasted second buffer) when pipeline_mode is available.
    """
    n = len(shape)
    idx = lambda *_: (0,) * n
    if _single_buffer_supported():
        return pl.BlockSpec(shape, idx, pipeline_mode=pl.Buffered(1))
    return pl.BlockSpec(shape, idx)


# ----------------------------------------------------------------------------
# Kernel A: RMSNorm1 + fused q/k/v projection + RoPE   (grid: B x q-tiles)
# ----------------------------------------------------------------------------
def _qkv_rope_kernel(x_ref, cos_ref, sin_ref, ln1_ref, wqkv_ref,
                     q_ref, k_ref, v_ref, *, num_heads, head_dim, eps):
    tq = x_ref.shape[1]
    hidden = x_ref.shape[2]
    half = head_dim // 2
    scale = 1.0 / math.sqrt(head_dim)

    # RMSNorm 1 (f32 elementwise).
    x = x_ref[0].astype(jnp.float32)                                 # (TQ, H)
    var = jnp.mean(x * x, axis=-1, keepdims=True)
    xn = x * lax.rsqrt(var + eps) * ln1_ref[...]

    # Fused q/k/v projection: bf16 in, f32 accumulate on the MXU.
    qkv = jnp.dot(xn.astype(jnp.bfloat16), wqkv_ref[...],
                  preferred_element_type=jnp.float32)                # (TQ, 3H)

    # RoPE pieces (f32).  rotate_half = roll (XLU) * sign, no slice+concat.
    cos = cos_ref[...]                                               # (TQ, HD)
    sin = sin_ref[...]
    sign = jnp.where(
        lax.broadcasted_iota(jnp.int32, (1, head_dim), 1) < half, -1.0, 1.0)
    sin_signed = sin * sign

    # Per-head slabs written straight into the head-major outputs
    # (no stack / concatenate materialization; loop is static & unrolled).
    for h in range(num_heads):
        q0 = h * head_dim
        k0 = hidden + h * head_dim
        v0 = 2 * hidden + h * head_dim
        qh = qkv[:, q0:q0 + head_dim] * scale     # fold 1/sqrt(hd) into q
        kh = qkv[:, k0:k0 + head_dim]
        vh = qkv[:, v0:v0 + head_dim]
        q_ref[0, h] = (qh * cos +
                       pltpu.roll(qh, shift=half, axis=1) * sin_signed
                       ).astype(q_ref.dtype)
        k_ref[0, h] = (kh * cos +
                       pltpu.roll(kh, shift=half, axis=1) * sin_signed
                       ).astype(k_ref.dtype)
        v_ref[0, h] = vh.astype(v_ref.dtype)


# ----------------------------------------------------------------------------
# Kernel B: flash attention (online softmax, causal tile skip) + o-proj +
#           residual                                 (grid: B x q-tiles x kv)
# ----------------------------------------------------------------------------
def _flash_attn_kernel(x_ref, q_ref, k_ref, v_ref, wo_ref, out_ref,
                       m_sc, l_sc, acc_sc, *, tile_q, tile_k):
    qi = pl.program_id(1)
    ki = pl.program_id(2)

    @pl.when(ki == 0)
    def _():
        m_sc[...] = jnp.full_like(m_sc, -jnp.inf)
        l_sc[...] = jnp.zeros_like(l_sc)
        acc_sc[...] = jnp.zeros_like(acc_sc)

    # Causal tile skip: kv tiles strictly above the diagonal contribute nothing.
    @pl.when(ki <= qi)
    def _():
        q = q_ref[0]                                    # (NH, TQ, HD) bf16
        k = k_ref[0]                                    # (NH, TK, HD) bf16
        s = jnp.einsum('hqd,hkd->hqk', q, k,
                       preferred_element_type=jnp.float32)   # (NH, TQ, TK) f32
        row = qi * tile_q + lax.broadcasted_iota(jnp.int32, (tile_q, tile_k), 0)
        col = ki * tile_k + lax.broadcasted_iota(jnp.int32, (tile_q, tile_k), 1)
        s = jnp.where((col <= row)[None], s, -1e30)

        m_new = jnp.maximum(m_sc[...], jnp.max(s, axis=-1, keepdims=True))
        alpha = jnp.exp(m_sc[...] - m_new)
        p = jnp.exp(s - m_new)
        l_sc[...] = alpha * l_sc[...] + jnp.sum(p, axis=-1, keepdims=True)
        acc_sc[...] = alpha * acc_sc[...] + jnp.einsum(
            'hqk,hkd->hqd', p.astype(jnp.bfloat16), v_ref[0],
            preferred_element_type=jnp.float32)
        m_sc[...] = m_new

    @pl.when(ki == pl.num_programs(2) - 1)
    def _():
        nh = acc_sc.shape[0]
        o = acc_sc[...] * pl.reciprocal(l_sc[...], approx=True)   # (NH, TQ, HD)
        # Merge heads once per q-tile, then ONE matmul: head reduction happens
        # in the MXU contraction dim (no per-head partial sums on the VPU).
        o2d = jnp.concatenate([o[h] for h in range(nh)], axis=-1)  # (TQ, H)
        attn = jnp.dot(o2d.astype(jnp.bfloat16), wo_ref[...],
                       preferred_element_type=jnp.float32)         # (TQ, H)
        out_ref[0] = (x_ref[0].astype(jnp.float32) + attn).astype(out_ref.dtype)


# ----------------------------------------------------------------------------
# Kernel C: RMSNorm2 + SwiGLU MLP (streamed over intermediate dim) + residual
#                                                    (grid: B x q-tiles x I)
# ----------------------------------------------------------------------------
def _mlp_kernel(x_ref, ln2_ref, wg_ref, wu_ref, wd_ref, out_ref,
                xn_sc, acc_sc, *, eps):
    ii = pl.program_id(2)

    @pl.when(ii == 0)
    def _():
        x = x_ref[0].astype(jnp.float32)                    # (TQ, H)
        var = jnp.mean(x * x, axis=-1, keepdims=True)
        xn = x * lax.rsqrt(var + eps) * ln2_ref[...]
        xn_sc[...] = xn.astype(jnp.bfloat16)                # cached across i-tiles
        acc_sc[...] = jnp.zeros_like(acc_sc)

    xn = xn_sc[...]                                          # (TQ, H) bf16
    g = jnp.dot(xn, wg_ref[...], preferred_element_type=jnp.float32)  # (TQ, TI)
    u = jnp.dot(xn, wu_ref[...], preferred_element_type=jnp.float32)
    h = (g * jax.nn.sigmoid(g)) * u                          # SiLU(gate)*up, f32
    acc_sc[...] += jnp.dot(h.astype(jnp.bfloat16), wd_ref[...],
                           preferred_element_type=jnp.float32)        # (TQ, H)

    @pl.when(ii == pl.num_programs(2) - 1)
    def _():
        out_ref[0] = (x_ref[0].astype(jnp.float32)
                      + acc_sc[...]).astype(out_ref.dtype)


# ----------------------------------------------------------------------------
# Wrapper: weight fusion/transpose/padding + the three pallas_calls
# ----------------------------------------------------------------------------
def decoder_layer(x, params, *, num_heads, eps=1e-5):
    B, S, H = x.shape
    head_dim = H // num_heads
    (ln1_w, qw, kw, vw, ow, ln2_w, gw, uw, dw, cos, sin) = params
    I = gw.shape[0]
    I_pad = ((I + 127) // 128) * 128          # lane-pad the MLP intermediate dim

    wdt = jnp.bfloat16
    # Pre-transposed (in, out), fused / padded, bf16 weights (one-time cost).
    wqkv = jnp.concatenate([qw, kw, vw], axis=0).T.astype(wdt)        # (H, 3H)
    wo_t = ow.T.astype(wdt)                                           # (H, H)
    wg_t = jnp.pad(gw, ((0, I_pad - I), (0, 0))).T.astype(wdt)        # (H, Ip)
    wu_t = jnp.pad(uw, ((0, I_pad - I), (0, 0))).T.astype(wdt)        # (H, Ip)
    wd_t = jnp.pad(dw, ((0, 0), (0, I_pad - I))).T.astype(wdt)        # (Ip, H)

    TQ = _tile(S)                      # q and kv tiles equal -> exact tile skip
    TI = _tile(I_pad, (512, 256, 128))
    n_q, n_kv, n_i = S // TQ, S // TQ, I_pad // TI

    # ---- A) RMSNorm1 + fused qkv + RoPE ------------------------------------
    q, k, v = pl.pallas_call(
        functools.partial(_qkv_rope_kernel, num_heads=num_heads,
                          head_dim=head_dim, eps=eps),
        out_shape=(
            jax.ShapeDtypeStruct((B, num_heads, S, head_dim), jnp.bfloat16),
            jax.ShapeDtypeStruct((B, num_heads, S, head_dim), jnp.bfloat16),
            jax.ShapeDtypeStruct((B, num_heads, S, head_dim), jnp.bfloat16)),
        grid_spec=pltpu.PrefetchScalarGridSpec(
            num_scalar_prefetch=0,
            grid=(B, n_q),
            in_specs=[
                pl.BlockSpec((1, TQ, H), lambda b, i: (b, i, 0)),      # x
                pl.BlockSpec((TQ, head_dim), lambda b, i: (i, 0)),     # cos
                pl.BlockSpec((TQ, head_dim), lambda b, i: (i, 0)),     # sin
                _resident_spec((1, H)),                                # ln_1
                _resident_spec((H, 3 * H)),                            # fused qkv
            ],
            out_specs=[
                pl.BlockSpec((1, num_heads, TQ, head_dim),
                             lambda b, i: (b, 0, i, 0)),
                pl.BlockSpec((1, num_heads, TQ, head_dim),
                             lambda b, i: (b, 0, i, 0)),
                pl.BlockSpec((1, num_heads, TQ, head_dim),
                             lambda b, i: (b, 0, i, 0)),
            ]),
        compiler_params=pltpu.CompilerParams(
            dimension_semantics=("parallel", "parallel"),
            vmem_limit_bytes=_VMEM_LIMIT),
    )(x, cos, sin, ln1_w, wqkv)

    # ---- B) flash attention + o-proj + residual ----------------------------
    x1 = pl.pallas_call(
        functools.partial(_flash_attn_kernel, tile_q=TQ, tile_k=TQ),
        out_shape=jax.ShapeDtypeStruct((B, S, H), x.dtype),
        grid_spec=pltpu.PrefetchScalarGridSpec(
            num_scalar_prefetch=0,
            grid=(B, n_q, n_kv),
            in_specs=[
                pl.BlockSpec((1, TQ, H), lambda b, i, j: (b, i, 0)),   # residual
                pl.BlockSpec((1, num_heads, TQ, head_dim),
                             lambda b, i, j: (b, 0, i, 0)),            # q
                pl.BlockSpec((1, num_heads, TQ, head_dim),
                             lambda b, i, j: (b, 0, j, 0)),            # k
                pl.BlockSpec((1, num_heads, TQ, head_dim),
                             lambda b, i, j: (b, 0, j, 0)),            # v
                _resident_spec((H, H)),                                # o_proj
            ],
            out_specs=pl.BlockSpec((1, TQ, H), lambda b, i, j: (b, i, 0)),
            scratch_shapes=[
                pltpu.VMEM((num_heads, TQ, 1), jnp.float32),           # m
                pltpu.VMEM((num_heads, TQ, 1), jnp.float32),           # l
                pltpu.VMEM((num_heads, TQ, head_dim), jnp.float32)]),  # acc
        compiler_params=pltpu.CompilerParams(
            dimension_semantics=("parallel", "parallel", "arbitrary"),
            vmem_limit_bytes=_VMEM_LIMIT),
    )(x, q, k, v, wo_t)

    # ---- C) RMSNorm2 + SwiGLU MLP + residual --------------------------------
    out = pl.pallas_call(
        functools.partial(_mlp_kernel, eps=eps),
        out_shape=jax.ShapeDtypeStruct((B, S, H), x.dtype),
        grid_spec=pltpu.PrefetchScalarGridSpec(
            num_scalar_prefetch=0,
            grid=(B, n_q, n_i),
            in_specs=[
                pl.BlockSpec((1, TQ, H), lambda b, i, j: (b, i, 0)),   # x1
                _resident_spec((1, H)),                                # ln_2
                pl.BlockSpec((H, TI), lambda b, i, j: (0, j)),         # gate (streamed)
                pl.BlockSpec((H, TI), lambda b, i, j: (0, j)),         # up   (streamed)
                pl.BlockSpec((TI, H), lambda b, i, j: (j, 0)),         # down (streamed)
            ],
            out_specs=pl.BlockSpec((1, TQ, H), lambda b, i, j: (b, i, 0)),
            scratch_shapes=[
                pltpu.VMEM((TQ, H), jnp.bfloat16),    # cached RMSNorm2(x1)
                pltpu.VMEM((TQ, H), jnp.float32)]),   # down-proj accumulator
        compiler_params=pltpu.CompilerParams(
            dimension_semantics=("parallel", "parallel", "arbitrary"),
            vmem_limit_bytes=_VMEM_LIMIT),
    )(x1, ln2_w, wg_t, wu_t, wd_t)

    return out


# ----------------------------------------------------------------------------
# Pure-JAX f32 reference (mirrors the PyTorch forward, masks=None causal path)
# ----------------------------------------------------------------------------
def decoder_layer_ref(x, params, *, num_heads):
    (ln1_w, qw, kw, vw, ow, ln2_w, gw, uw, dw, cos, sin) = params
    B, S, H = x.shape
    hd = H // num_heads
    eps = 1e-5

    def rms(t, w):
        var = jnp.mean(t * t, axis=-1, keepdims=True)
        return t * lax.rsqrt(var + eps) * w

    def rot_half(t):
        return jnp.concatenate([-t[..., hd // 2:], t[..., :hd // 2]], axis=-1)

    xn = rms(x, ln1_w[0])
    q = (xn @ qw.T).reshape(B, S, num_heads, hd).transpose(0, 2, 1, 3)
    k = (xn @ kw.T).reshape(B, S, num_heads, hd).transpose(0, 2, 1, 3)
    v = (xn @ vw.T).reshape(B, S, num_heads, hd).transpose(0, 2, 1, 3)
    cos_b = cos[None, None]
    sin_b = sin[None, None]
    q = q * cos_b + rot_half(q) * sin_b
    k = k * cos_b + rot_half(k) * sin_b
    s = jnp.einsum('bhqd,bhkd->bhqk', q, k) / math.sqrt(hd)
    mask = jnp.tril(jnp.ones((S, S), dtype=bool))
    s = jnp.where(mask, s, -1e30)
    p = jax.nn.softmax(s, axis=-1)
    o = jnp.einsum('bhqk,bhkd->bhqd', p, v).transpose(0, 2, 1, 3).reshape(B, S, H)
    x1 = x + o @ ow.T

    xn2 = rms(x1, ln2_w[0])
    g = jax.nn.silu(xn2 @ gw.T)
    u = xn2 @ uw.T
    return x1 + (g * u) @ dw.T


# ----------------------------------------------------------------------------
# Main
# ----------------------------------------------------------------------------
if __name__ == "__main__":
    B, S, H, NH = 2, 16, 32, 4        # batch, seq, hidden, heads
    HD = H // NH                      # head_dim = 8
    I = int(H * 2.68)                 # intermediate_size = 85 (as in MLP)

    key = jax.random.PRNGKey(0)
    ks = jax.random.split(key, 9)

    def linear_w(k, out_f, in_f):
        bound = 1.0 / math.sqrt(in_f)
        return jax.random.uniform(k, (out_f, in_f), jnp.float32, -bound, bound)

    x = jax.random.normal(ks[0], (B, S, H), jnp.float32)
    ln1_w = jnp.ones((1, H), jnp.float32)
    ln2_w = jnp.ones((1, H), jnp.float32)
    qw = linear_w(ks[1], H, H)
    kw = linear_w(ks[2], H, H)
    vw = linear_w(ks[3], H, H)
    ow = linear_w(ks[4], H, H)
    gw = linear_w(ks[5], I, H)
    uw = linear_w(ks[6], I, H)
    dw = linear_w(ks[7], H, I)

    # Rotary cos/sin cache (position_ids = arange(S)), matching RotaryEmbedding.
    inv_freq = 1.0 / (10000.0 ** (jnp.arange(0, HD, 2, dtype=jnp.float32) / HD))
    t = jnp.arange(S, dtype=jnp.float32)
    freqs = jnp.einsum('i,j->ij', t, inv_freq)
    emb = jnp.concatenate([freqs, freqs], axis=-1)             # (S, HD)
    cos = jnp.cos(emb)
    sin = jnp.sin(emb)

    params = (ln1_w, qw, kw, vw, ow, ln2_w, gw, uw, dw, cos, sin)

    out = decoder_layer(x, params, num_heads=NH)
    out = jax.block_until_ready(out)

    ref = decoder_layer_ref(x, params, num_heads=NH)
    ref = jax.block_until_ready(ref)

    assert out.shape == (B, S, H)
    # bf16 MXU inputs (f32 accumulate) + approx reciprocal vs. pure-f32 ref.
    assert jnp.allclose(out, ref, rtol=2e-2, atol=2e-2), \
        f"max abs err = {jnp.max(jnp.abs(out - ref))}"

    print("KERNEL_OK")
</pallas_src>

<mosaic_0001>
module attributes {stable_mosaic.version = 11 : i64} {
  func.func @_k(%arg0: i32, %arg1: memref<8x128xf32, #tpu.memory_space<vmem>>, %arg2: memref<8x128xf32, #tpu.memory_space<vmem>>) attributes {dimension_semantics = [#tpu.dimension_semantics<arbitrary>], iteration_bounds = array<i64: 2>, scalar_prefetch = 0 : i64, scratch_operands = 0 : i64, tpu.core_type = #tpu.core_type<tc>, window_params = [{pipeline_mode = #tpu.pipeline_mode<synchronous>, transform_indices = @transform_0, window_bounds = array<i64: 8, 128>}, {pipeline_mode = #tpu.pipeline_mode<synchronous>, transform_indices = @transform_1, window_bounds = array<i64: 8, 128>}]} {
    %c0 = arith.constant 0 : index
    %c0_0 = arith.constant 0 : index
    %0 = vector.load %arg1[%c0, %c0_0] : memref<8x128xf32, #tpu.memory_space<vmem>>, vector<8x128xf32>
    %cst = arith.constant 2.000000e+00 : f32
    %1 = vector.broadcast %cst : f32 to vector<8x128xf32>
    %2 = arith.mulf %0, %1 : vector<8x128xf32>
    %c0_1 = arith.constant 0 : index
    %c0_2 = arith.constant 0 : index
    %3 = vector.load %arg2[%c0_1, %c0_2] : memref<8x128xf32, #tpu.memory_space<vmem>>, vector<8x128xf32>
    tpu.vector_store %arg2[%c0_1, %c0_2], %2 {strides = array<i32>} : memref<8x128xf32, #tpu.memory_space<vmem>>, vector<8x128xf32>,
    return
  }
  func.func @transform_0(%arg0: i32) -> (i32, i32) {
    %c0_i32 = arith.constant 0 : i32
    %c0_i32_0 = arith.constant 0 : i32
    %c0_i32_1 = arith.constant 0 : i32
    return %c0_i32, %c0_i32_0 : i32, i32
  }
  func.func @transform_1(%arg0: i32) -> (i32, i32) {
    %c0_i32 = arith.constant 0 : i32
    %c0_i32_0 = arith.constant 0 : i32
    %c0_i32_1 = arith.constant 0 : i32
    return %c0_i32, %c0_i32_0 : i32, i32
  }
}

module attributes {stable_mosaic.version = 11 : i64} {
  func.func @_qkv_rope_kernel(%arg0: i32, %arg1: i32, %arg2: memref<1x16x32xf32, #tpu.memory_space<vmem>>, %arg3: memref<16x8xf32, #tpu.memory_space<vmem>>, %arg4: memref<16x8xf32, #tpu.memory_space<vmem>>, %arg5: memref<1x32xf32, #tpu.memory_space<vmem>>, %arg6: memref<32x96xbf16, #tpu.memory_space<vmem>>, %arg7: memref<1x4x16x8xbf16, #tpu.memory_space<vmem>>, %arg8: memref<1x4x16x8xbf16, #tpu.memory_space<vmem>>, %arg9: memref<1x4x16x8xbf16, #tpu.memory_space<vmem>>) attributes {dimension_semantics = [#tpu.dimension_semantics<parallel>, #tpu.dimension_semantics<parallel>], iteration_bounds = array<i64: 2, 1>, scalar_prefetch = 0 : i64, scratch_operands = 0 : i64, tpu.core_type = #tpu.core_type<tc>, window_params = [{transform_indices = @transform_0, window_bounds = array<i64: 1, 16, 32>}, {transform_indices = @transform_1, window_bounds = array<i64: 16, 8>}, {transform_indices = @transform_2, window_bounds = array<i64: 16, 8>}, {pipeline_mode = #tpu.pipeline_mode<synchronous>, transform_indices = @transform_3, window_bounds = array<i64: 1, 32>}, {pipeline_mode = #tpu.pipeline_mode<synchronous>, transform_indices = @transform_4, window_bounds = array<i64: 32, 96>}, {transform_indices = @transform_5, window_bounds = array<i64: 1, 4, 16, 8>}, {transform_indices = @transform_6, window_bounds = array<i64: 1, 4, 16, 8>}, {transform_indices = @transform_7, window_bounds = array<i64: 1, 4, 16, 8>}]} {
    %c0 = arith.constant 0 : index
    %c0_0 = arith.constant 0 : index
    %c0_1 = arith.constant 0 : index
    %0 = vector.load %arg2[%c0, %c0_0, %c0_1] : memref<1x16x32xf32, #tpu.memory_space<vmem>>, vector<1x16x32xf32>
    %1 = vector.shape_cast %0 : vector<1x16x32xf32> to vector<16x32xf32>
    %2 = arith.mulf %1, %1 : vector<16x32xf32>
    %cst = arith.constant dense<0.000000e+00> : vector<16xf32>
    %3 = vector.multi_reduction <add>, %2, %cst [1] : vector<16x32xf32> to vector<16xf32>
    %4 = vector.shape_cast %3 : vector<16xf32> to vector<16x1xf32>
    %cst_2 = arith.constant 3.200000e+01 : f32
    %5 = vector.broadcast %cst_2 : f32 to vector<16x1xf32>
    %6 = arith.divf %4, %5 : vector<16x1xf32>
    %cst_3 = arith.constant 9.99999974E-6 : f32
    %7 = vector.broadcast %cst_3 : f32 to vector<16x1xf32>
    %8 = arith.addf %6, %7 : vector<16x1xf32>
    %9 = math.rsqrt %8 : vector<16x1xf32>
    %10 = vector.broadcast %9 : vector<16x1xf32> to vector<16x32xf32>
    %11 = arith.mulf %1, %10 : vector<16x32xf32>
    %c0_4 = arith.constant 0 : index
    %c0_5 = arith.constant 0 : index
    %12 = vector.load %arg5[%c0_4, %c0_5] : memref<1x32xf32, #tpu.memory_space<vmem>>, vector<1x32xf32>
    %13 = vector.broadcast %12 : vector<1x32xf32> to vector<16x32xf32>
    %14 = arith.mulf %11, %13 : vector<16x32xf32>
    %15 = arith.truncf %14 : vector<16x32xf32> to vector<16x32xbf16>
    %c0_6 = arith.constant 0 : index
    %c0_7 = arith.constant 0 : index
    %16 = vector.load %arg6[%c0_6, %c0_7] : memref<32x96xbf16, #tpu.memory_space<vmem>>, vector<32x96xbf16>
    %cst_8 = arith.constant dense<0.000000e+00> : vector<16x96xf32>
    %17 = tpu.matmul %15, %16, %cst_8 {dimension_numbers = #tpu.dot_dimension_numbers<[1], [0], [0], [1], [0, 0, 1, 1], [], []>} : vector<16x32xbf16>, vector<32x96xbf16>, vector<16x96xf32> -> vector<16x96xf32>
    %c0_9 = arith.constant 0 : index
    %c0_10 = arith.constant 0 : index
    %18 = vector.load %arg3[%c0_9, %c0_10] : memref<16x8xf32, #tpu.memory_space<vmem>>, vector<16x8xf32>
    %c0_11 = arith.constant 0 : index
    %c0_12 = arith.constant 0 : index
    %19 = vector.load %arg4[%c0_11, %c0_12] : memref<16x8xf32, #tpu.memory_space<vmem>>, vector<16x8xf32>
    %20 = tpu.iota {dimensions = array<i32: 1>} : vector<1x8xi32>
    %c4_i32 = arith.constant 4 : i32
    %21 = vector.broadcast %c4_i32 : i32 to vector<1x8xi32>
    %22 = arith.cmpi slt, %20, %21 : vector<1x8xi32>
    %cst_13 = arith.constant -1.000000e+00 : f32
    %cst_14 = arith.constant 1.000000e+00 : f32
    %23 = vector.broadcast %cst_13 : f32 to vector<1x8xf32>
    %24 = vector.broadcast %cst_14 : f32 to vector<1x8xf32>
    %25 = arith.select %22, %23, %24 : vector<1x8xi1>, vector<1x8xf32>
    %26 = vector.broadcast %25 : vector<1x8xf32> to vector<16x8xf32>
    %27 = arith.mulf %19, %26 : vector<16x8xf32>
    %28 = vector.extract_strided_slice %17 {offsets = [0, 0], sizes = [16, 8], strides = [1, 1]} : vector<16x96xf32> to vector<16x8xf32>
    %cst_15 = arith.constant 0.353553385 : f32
    %29 = vector.broadcast %cst_15 : f32 to vector<16x8xf32>
    %30 = arith.mulf %28, %29 : vector<16x8xf32>
    %31 = vector.extract_strided_slice %17 {offsets = [0, 32], sizes = [16, 8], strides = [1, 1]} : vector<16x96xf32> to vector<16x8xf32>
    %32 = vector.extract_strided_slice %17 {offsets = [0, 64], sizes = [16, 8], strides = [1, 1]} : vector<16x96xf32> to vector<16x8xf32>
    %33 = arith.mulf %30, %18 : vector<16x8xf32>
    %c4_i32_16 = arith.constant 4 : i32
    %34 = tpu.dynamic_rotate %30 by %c4_i32_16 dim 1 : vector<16x8xf32>, i32 -> vector<16x8xf32>
    %35 = arith.mulf %34, %27 : vector<16x8xf32>
    %36 = arith.addf %33, %35 : vector<16x8xf32>
    %37 = arith.truncf %36 : vector<16x8xf32> to vector<16x8xbf16>
    %c0_17 = arith.constant 0 : index
    %c0_18 = arith.constant 0 : index
    %c0_19 = arith.constant 0 : index
    %c0_20 = arith.constant 0 : index
    %38 = vector.load %arg7[%c0_17, %c0_18, %c0_19, %c0_20] : memref<1x4x16x8xbf16, #tpu.memory_space<vmem>>, vector<1x1x16x8xbf16>
    %39 = vector.shape_cast %38 : vector<1x1x16x8xbf16> to vector<16x8xbf16>
    %40 = vector.shape_cast %37 : vector<16x8xbf16> to vector<1x1x16x8xbf16>
    tpu.vector_store %arg7[%c0_17, %c0_18, %c0_19, %c0_20], %40 {strides = array<i32>} : memref<1x4x16x8xbf16, #tpu.memory_space<vmem>>, vector<1x1x16x8xbf16>,
    %41 = arith.mulf %31, %18 : vector<16x8xf32>
    %c4_i32_21 = arith.constant 4 : i32
    %42 = tpu.dynamic_rotate %31 by %c4_i32_21 dim 1 : vector<16x8xf32>, i32 -> vector<16x8xf32>
    %43 = arith.mulf %42, %27 : vector<16x8xf32>
    %44 = arith.addf %41, %43 : vector<16x8xf32>
    %45 = arith.truncf %44 : vector<16x8xf32> to vector<16x8xbf16>
    %c0_22 = arith.constant 0 : index
    %c0_23 = arith.constant 0 : index
    %c0_24 = arith.constant 0 : index
    %c0_25 = arith.constant 0 : index
    %46 = vector.load %arg8[%c0_22, %c0_23, %c0_24, %c0_25] : memref<1x4x16x8xbf16, #tpu.memory_space<vmem>>, vector<1x1x16x8xbf16>
    %47 = vector.shape_cast %46 : vector<1x1x16x8xbf16> to vector<16x8xbf16>
    %48 = vector.shape_cast %45 : vector<16x8xbf16> to vector<1x1x16x8xbf16>
    tpu.vector_store %arg8[%c0_22, %c0_23, %c0_24, %c0_25], %48 {strides = array<i32>} : memref<1x4x16x8xbf16, #tpu.memory_space<vmem>>, vector<1x1x16x8xbf16>,
    %49 = arith.truncf %32 : vector<16x8xf32> to vector<16x8xbf16>
    %c0_26 = arith.constant 0 : index
    %c0_27 = arith.constant 0 : index
    %c0_28 = arith.constant 0 : index
    %c0_29 = arith.constant 0 : index
    %50 = vector.load %arg9[%c0_26, %c0_27, %c0_28, %c0_29] : memref<1x4x16x8xbf16, #tpu.memory_space<vmem>>, vector<1x1x16x8xbf16>
    %51 = vector.shape_cast %50 : vector<1x1x16x8xbf16> to vector<16x8xbf16>
    %52 = vector.shape_cast %49 : vector<16x8xbf16> to vector<1x1x16x8xbf16>
    tpu.vector_store %arg9[%c0_26, %c0_27, %c0_28, %c0_29], %52 {strides = array<i32>} : memref<1x4x16x8xbf16, #tpu.memory_space<vmem>>, vector<1x1x16x8xbf16>,
    %53 = vector.extract_strided_slice %17 {offsets = [0, 8], sizes = [16, 8], strides = [1, 1]} : vector<16x96xf32> to vector<16x8xf32>
    %cst_30 = arith.constant 0.353553385 : f32
    %54 = vector.broadcast %cst_30 : f32 to vector<16x8xf32>
    %55 = arith.mulf %53, %54 : vector<16x8xf32>
    %56 = vector.extract_strided_slice %17 {offsets = [0, 40], sizes = [16, 8], strides = [1, 1]} : vector<16x96xf32> to vector<16x8xf32>
    %57 = vector.extract_strided_slice %17 {offsets = [0, 72], sizes = [16, 8], strides = [1, 1]} : vector<16x96xf32> to vector<16x8xf32>
    %58 = arith.mulf %55, %18 : vector<16x8xf32>
    %c4_i32_31 = arith.constant 4 : i32
    %59 = tpu.dynamic_rotate %55 by %c4_i32_31 dim 1 : vector<16x8xf32>, i32 -> vector<16x8xf32>
    %60 = arith.mulf %59, %27 : vector<16x8xf32>
    %61 = arith.addf %58, %60 : vector<16x8xf32>
    %62 = arith.truncf %61 : vector<16x8xf32> to vector<16x8xbf16>
    %c0_32 = arith.constant 0 : index
    %c1 = arith.constant 1 : index
    %c0_33 = arith.constant 0 : index
    %c0_34 = arith.constant 0 : index
    %63 = vector.load %arg7[%c0_32, %c1, %c0_33, %c0_34] : memref<1x4x16x8xbf16, #tpu.memory_space<vmem>>, vector<1x1x16x8xbf16>
    %64 = vector.shape_cast %63 : vector<1x1x16x8xbf16> to vector<16x8xbf16>
    %65 = vector.shape_cast %62 : vector<16x8xbf16> to vector<1x1x16x8xbf16>
    tpu.vector_store %arg7[%c0_32, %c1, %c0_33, %c0_34], %65 {strides = array<i32>} : memref<1x4x16x8xbf16, #tpu.memory_space<vmem>>, vector<1x1x16x8xbf16>,
    %66 = arith.mulf %56, %18 : vector<16x8xf32>
    %c4_i32_35 = arith.constant 4 : i32
    %67 = tpu.dynamic_rotate %56 by %c4_i32_35 dim 1 : vector<16x8xf32>, i32 -> vector<16x8xf32>
    %68 = arith.mulf %67, %27 : vector<16x8xf32>
    %69 = arith.addf %66, %68 : vector<16x8xf32>
    %70 = arith.truncf %69 : vector<16x8xf32> to vector<16x8xbf16>
    %c0_36 = arith.constant 0 : index
    %c1_37 = arith.constant 1 : index
    %c0_38 = arith.constant 0 : index
    %c0_39 = arith.constant 0 : index
    %71 = vector.load %arg8[%c0_36, %c1_37, %c0_38, %c0_39] : memref<1x4x16x8xbf16, #tpu.memory_space<vmem>>, vector<1x1x16x8xbf16>
    %72 = vector.shape_cast %71 : vector<1x1x16x8xbf16> to vector<16x8xbf16>
    %73 = vector.shape_cast %70 : vector<16x8xbf16> to vector<1x1x16x8xbf16>
    tpu.vector_store %arg8[%c0_36, %c1_37, %c0_38, %c0_39], %73 {strides = array<i32>} : memref<1x4x16x8xbf16, #tpu.memory_space<vmem>>, vector<1x1x16x8xbf16>,
    %74 = arith.truncf %57 : vector<16x8xf32> to vector<16x8xbf16>
    %c0_40 = arith.constant 0 : index
    %c1_41 = arith.constant 1 : index
    %c0_42 = arith.constant 0 : index
    %c0_43 = arith.constant 0 : index
    %75 = vector.load %arg9[%c0_40, %c1_41, %c0_42, %c0_43] : memref<1x4x16x8xbf16, #tpu.memory_space<vmem>>, vector<1x1x16x8xbf16>
    %76 = vector.shape_cast %75 : vector<1x1x16x8xbf16> to vector<16x8xbf16>
    %77 = vector.shape_cast %74 : vector<16x8xbf16> to vector<1x1x16x8xbf16>
    tpu.vector_store %arg9[%c0_40, %c1_41, %c0_42, %c0_43], %77 {strides = array<i32>} : memref<1x4x16x8xbf16, #tpu.memory_space<vmem>>, vector<1x1x16x8xbf16>,
    %78 = vector.extract_strided_slice %17 {offsets = [0, 16], sizes = [16, 8], strides = [1, 1]} : vector<16x96xf32> to vector<16x8xf32>
    %cst_44 = arith.constant 0.353553385 : f32
    %79 = vector.broadcast %cst_44 : f32 to vector<16x8xf32>
    %80 = arith.mulf %78, %79 : vector<16x8xf32>
    %81 = vector.extract_strided_slice %17 {offsets = [0, 48], sizes = [16, 8], strides = [1, 1]} : vector<16x96xf32> to vector<16x8xf32>
    %82 = vector.extract_strided_slice %17 {offsets = [0, 80], sizes = [16, 8], strides = [1, 1]} : vector<16x96xf32> to vector<16x8xf32>
    %83 = arith.mulf %80, %18 : vector<16x8xf32>
    %c4_i32_45 = arith.constant 4 : i32
    %84 = tpu.dynamic_rotate %80 by %c4_i32_45 dim 1 : vector<16x8xf32>, i32 -> vector<16x8xf32>
    %85 = arith.mulf %84, %27 : vector<16x8xf32>
    %86 = arith.addf %83, %85 : vector<16x8xf32>
    %87 = arith.truncf %86 : vector<16x8xf32> to vector<16x8xbf16>
    %c0_46 = arith.constant 0 : index
    %c2 = arith.constant 2 : index
    %c0_47 = arith.constant 0 : index
    %c0_48 = arith.constant 0 : index
    %88 = vector.load %arg7[%c0_46, %c2, %c0_47, %c0_48] : memref<1x4x16x8xbf16, #tpu.memory_space<vmem>>, vector<1x1x16x8xbf16>
    %89 = vector.shape_cast %88 : vector<1x1x16x8xbf16> to vector<16x8xbf16>
    %90 = vector.shape_cast %87 : vector<16x8xbf16> to vector<1x1x16x8xbf16>
    tpu.vector_store %arg7[%c0_46, %c2, %c0_47, %c0_48], %90 {strides = array<i32>} : memref<1x4x16x8xbf16, #tpu.memory_space<vmem>>, vector<1x1x16x8xbf16>,
    %91 = arith.mulf %81, %18 : vector<16x8xf32>
    %c4_i32_49 = arith.constant 4 : i32
    %92 = tpu.dynamic_rotate %81 by %c4_i32_49 dim 1 : vector<16x8xf32>, i32 -> vector<16x8xf32>
    %93 = arith.mulf %92, %27 : vector<16x8xf32>
    %94 = arith.addf %91, %93 : vector<16x8xf32>
    %95 = arith.truncf %94 : vector<16x8xf32> to vector<16x8xbf16>
    %c0_50 = arith.constant 0 : index
    %c2_51 = arith.constant 2 : index
    %c0_52 = arith.constant 0 : index
    %c0_53 = arith.constant 0 : index
    %96 = vector.load %arg8[%c0_50, %c2_51, %c0_52, %c0_53] : memref<1x4x16x8xbf16, #tpu.memory_space<vmem>>, vector<1x1x16x8xbf16>
    %97 = vector.shape_cast %96 : vector<1x1x16x8xbf16> to vector<16x8xbf16>
    %98 = vector.shape_cast %95 : vector<16x8xbf16> to vector<1x1x16x8xbf16>
    tpu.vector_store %arg8[%c0_50, %c2_51, %c0_52, %c0_53], %98 {strides = array<i32>} : memref<1x4x16x8xbf16, #tpu.memory_space<vmem>>, vector<1x1x16x8xbf16>,
    %99 = arith.truncf %82 : vector<16x8xf32> to vector<16x8xbf16>
    %c0_54 = arith.constant 0 : index
    %c2_55 = arith.constant 2 : index
    %c0_56 = arith.constant 0 : index
    %c0_57 = arith.constant 0 : index
    %100 = vector.load %arg9[%c0_54, %c2_55, %c0_56, %c0_57] : memref<1x4x16x8xbf16, #tpu.memory_space<vmem>>, vector<1x1x16x8xbf16>
    %101 = vector.shape_cast %100 : vector<1x1x16x8xbf16> to vector<16x8xbf16>
    %102 = vector.shape_cast %99 : vector<16x8xbf16> to vector<1x1x16x8xbf16>
    tpu.vector_store %arg9[%c0_54, %c2_55, %c0_56, %c0_57], %102 {strides = array<i32>} : memref<1x4x16x8xbf16, #tpu.memory_space<vmem>>, vector<1x1x16x8xbf16>,
    %103 = vector.extract_strided_slice %17 {offsets = [0, 24], sizes = [16, 8], strides = [1, 1]} : vector<16x96xf32> to vector<16x8xf32>
    %cst_58 = arith.constant 0.353553385 : f32
    %104 = vector.broadcast %cst_58 : f32 to vector<16x8xf32>
    %105 = arith.mulf %103, %104 : vector<16x8xf32>
    %106 = vector.extract_strided_slice %17 {offsets = [0, 56], sizes = [16, 8], strides = [1, 1]} : vector<16x96xf32> to vector<16x8xf32>
    %107 = vector.extract_strided_slice %17 {offsets = [0, 88], sizes = [16, 8], strides = [1, 1]} : vector<16x96xf32> to vector<16x8xf32>
    %108 = arith.mulf %105, %18 : vector<16x8xf32>
    %c4_i32_59 = arith.constant 4 : i32
    %109 = tpu.dynamic_rotate %105 by %c4_i32_59 dim 1 : vector<16x8xf32>, i32 -> vector<16x8xf32>
    %110 = arith.mulf %109, %27 : vector<16x8xf32>
    %111 = arith.addf %108, %110 : vector<16x8xf32>
    %112 = arith.truncf %111 : vector<16x8xf32> to vector<16x8xbf16>
    %c0_60 = arith.constant 0 : index
    %c3 = arith.constant 3 : index
    %c0_61 = arith.constant 0 : index
    %c0_62 = arith.constant 0 : index
    %113 = vector.load %arg7[%c0_60, %c3, %c0_61, %c0_62] : memref<1x4x16x8xbf16, #tpu.memory_space<vmem>>, vector<1x1x16x8xbf16>
    %114 = vector.shape_cast %113 : vector<1x1x16x8xbf16> to vector<16x8xbf16>
    %115 = vector.shape_cast %112 : vector<16x8xbf16> to vector<1x1x16x8xbf16>
    tpu.vector_store %arg7[%c0_60, %c3, %c0_61, %c0_62], %115 {strides = array<i32>} : memref<1x4x16x8xbf16, #tpu.memory_space<vmem>>, vector<1x1x16x8xbf16>,
    %116 = arith.mulf %106, %18 : vector<16x8xf32>
    %c4_i32_63 = arith.constant 4 : i32
    %117 = tpu.dynamic_rotate %106 by %c4_i32_63 dim 1 : vector<16x8xf32>, i32 -> vector<16x8xf32>
    %118 = arith.mulf %117, %27 : vector<16x8xf32>
    %119 = arith.addf %116, %118 : vector<16x8xf32>
    %120 = arith.truncf %119 : vector<16x8xf32> to vector<16x8xbf16>
    %c0_64 = arith.constant 0 : index
    %c3_65 = arith.constant 3 : index
    %c0_66 = arith.constant 0 : index
    %c0_67 = arith.constant 0 : index
    %121 = vector.load %arg8[%c0_64, %c3_65, %c0_66, %c0_67] : memref<1x4x16x8xbf16, #tpu.memory_space<vmem>>, vector<1x1x16x8xbf16>
    %122 = vector.shape_cast %121 : vector<1x1x16x8xbf16> to vector<16x8xbf16>
    %123 = vector.shape_cast %120 : vector<16x8xbf16> to vector<1x1x16x8xbf16>
    tpu.vector_store %arg8[%c0_64, %c3_65, %c0_66, %c0_67], %123 {strides = array<i32>} : memref<1x4x16x8xbf16, #tpu.memory_space<vmem>>, vector<1x1x16x8xbf16>,
    %124 = arith.truncf %107 : vector<16x8xf32> to vector<16x8xbf16>
    %c0_68 = arith.constant 0 : index
    %c3_69 = arith.constant 3 : index
    %c0_70 = arith.constant 0 : index
    %c0_71 = arith.constant 0 : index
    %125 = vector.load %arg9[%c0_68, %c3_69, %c0_70, %c0_71] : memref<1x4x16x8xbf16, #tpu.memory_space<vmem>>, vector<1x1x16x8xbf16>
    %126 = vector.shape_cast %125 : vector<1x1x16x8xbf16> to vector<16x8xbf16>
    %127 = vector.shape_cast %124 : vector<16x8xbf16> to vector<1x1x16x8xbf16>
    tpu.vector_store %arg9[%c0_68, %c3_69, %c0_70, %c0_71], %127 {strides = array<i32>} : memref<1x4x16x8xbf16, #tpu.memory_space<vmem>>, vector<1x1x16x8xbf16>,
    return
  }
  func.func @transform_0(%arg0: i32, %arg1: i32) -> (i32, i32, i32) {
    %c0_i32 = arith.constant 0 : i32
    %c0_i32_0 = arith.constant 0 : i32
    return %arg0, %arg1, %c0_i32 : i32, i32, i32
  }
  func.func @transform_1(%arg0: i32, %arg1: i32) -> (i32, i32) {
    %c0_i32 = arith.constant 0 : i32
    %c0_i32_0 = arith.constant 0 : i32
    return %arg1, %c0_i32 : i32, i32
  }
  func.func @transform_2(%arg0: i32, %arg1: i32) -> (i32, i32) {
    %c0_i32 = arith.constant 0 : i32
    %c0_i32_0 = arith.constant 0 : i32
    return %arg1, %c0_i32 : i32, i32
  }
  func.func @transform_3(%arg0: i32, %arg1: i32) -> (i32, i32) {
    %c0_i32 = arith.constant 0 : i32
    %c0_i32_0 = arith.constant 0 : i32
    %c0_i32_1 = arith.constant 0 : i32
    return %c0_i32, %c0_i32_0 : i32, i32
  }
  func.func @transform_4(%arg0: i32, %arg1: i32) -> (i32, i32) {
    %c0_i32 = arith.constant 0 : i32
    %c0_i32_0 = arith.constant 0 : i32
    %c0_i32_1 = arith.constant 0 : i32
    return %c0_i32, %c0_i32_0 : i32, i32
  }
  func.func @transform_5(%arg0: i32, %arg1: i32) -> (i32, i32, i32, i32) {
    %c0_i32 = arith.constant 0 : i32
    %c0_i32_0 = arith.constant 0 : i32
    %c0_i32_1 = arith.constant 0 : i32
    return %arg0, %c0_i32, %arg1, %c0_i32_0 : i32, i32, i32, i32
  }
  func.func @transform_6(%arg0: i32, %arg1: i32) -> (i32, i32, i32, i32) {
    %c0_i32 = arith.constant 0 : i32
    %c0_i32_0 = arith.constant 0 : i32
    %c0_i32_1 = arith.constant 0 : i32
    return %arg0, %c0_i32, %arg1, %c0_i32_0 : i32, i32, i32, i32
  }
  func.func @transform_7(%arg0: i32, %arg1: i32) -> (i32, i32, i32, i32) {
    %c0_i32 = arith.constant 0 : i32
    %c0_i32_0 = arith.constant 0 : i32
    %c0_i32_1 = arith.constant 0 : i32
    return %arg0, %c0_i32, %arg1, %c0_i32_0 : i32, i32, i32, i32
  }
}

</mosaic_0001>

<bundles_post_ra>
// kernel: tpu_custom_call.1
= control target key start
LH: loop header
LB: loop body
LE: loop exit
PB: predicated region body
PF: predicated region fallthrough
CT: control target
= control target key end

     0   :  { %6 = vsyncpa [#allocation3], 0  ;;  %s341_s0 = inlined_call_operand.hbm [shape: f32[8,128], index: 0, kind: input, shape index: {}]   ;;  %s342_s1 = inlined_call_operand.hbm [shape: f32[8,128], index: 1, kind: output, shape index: {}]  }
   0x1   :  { %7 = vsyncpa [#allocation4], 0  ;;  %s262_s6 = smov 0  }
   0x2 LB: > { %s145_s7 = sadd.s32 4294967295, %s248_s6   ;;  %p146_p0 = scmp.ge.s32.totalorder %s248_s6, 1  ;;  %s248_s6 = sphi %s262_s6, %s13_s6  }
   0x3   : > { %p60_p1 = scmp.lt.s32.totalorder %s248_s6, 3  ;;  %p276_p3 = scmp.eq.s32.totalorder %s145_s7, 0 }
   0x4   : > { %s250_s10 = smov [#allocation2]   ;;  %s180_s15 = scalar_lea.hbm %s341_s0, 128 }
   0x5   : > { %p270_p2 = pnand %p146_p0, %p60_p1  ;;  %s73_s11 = sshll.u32 %s250_s10, 4  ;;  %s74_s11 = int_to_ptr.vmem [resolvable:$true] %s73_s11 }
   0x6   : > { %s347_s9 = scalar_select %p276_p3, 1, 0 }
   0x7   : > { %s346_s8 = scalar_select %p270_p2, 1, 0 }
   0x8   : > { %p162_p4 = pneg %p270_p2  ;;  %p181_p6 = scmp.ne.s32.totalorder %s341_s0, %s180_s15 }
   0x9   : > { %p187_p10 = scmp.lt.u32.totalorder %s180_s15, %s341_s0 }
   0xa   : > { %p284_p5 = pnand %p276_p3, %p162_p4 }
   0xc   : > { %p182_p7 = pneg %p284_p5 }
   0xe   : > { %p183_p8 = pnand %p182_p7, %p181_p6 }
  0x10   : > { %p184_p9 = pneg %p183_p8 }
  0x12   : > { %p189_p11 = pnand %p187_p10, %p184_p9 }
  0x14   : > { %192 = shalt.err (!%p189_p11)
}
  0x15   : > { %s193_s20 = scalar_lea.vmem %s74_s11, 128  ;;  %p201_p1 = scmp.lt.s32.totalorder %s74_s11, %s74_s11 }
  0x16   : > { %p194_p12 = scmp.ne.s32.totalorder %s74_s11, %s193_s20  ;;  %p202_p4 = scmp.lt.s32.totalorder %s193_s20, %s193_s20 }
  0x18   : > { %p196_p13 = pnand %p194_p12, %p182_p7  ;;  %p203_p3 = por %p202_p4, %p201_p1 }
  0x1a   : > { %p197_p0 = pneg %p196_p13 }
  0x1c   : > { %p204_p2 = pnand %p203_p3, %p197_p0 }
  0x1e   : > { %207 = shalt.err (!%p204_p2)
}
  0x1f   : > { %165 = dma.hbm_to_vmem [thread:$0]  (!%p284_p5), %s341_s0, 128, %s74_s11, [#allocation3]  }
  0x20   : > { %p349_p6 = scmp.ne.s32.totalorder %s346_s8, 0 }
  0x21   : > { %p350_p8 = scmp.ne.s32.totalorder (!%p349_p6), %s347_s9, 0 }
  0x22   : > { %86 = sbr.rel (%p349_p6) target bundleno = 67 (0x43), region = 24 }
  0x29   : > { %239 = dma.done.wait (%p350_p8), [#allocation3], 128  }
  0x2a   : > { %241 = vsyncadd (%p350_p8), [#allocation3], 4294967168  ;;  %s251_s23 = smov [#allocation5]   ;;  %v96_v0 = vld [vmem:[#allocation2] sm:$0xff]  ;;  %p312_p2 = scmp.eq.s32.totalorder %s145_s7, 1 }
  0x2b   : > { %s106_s24 = sshll.u32 %s251_s23, 4  ;;  %v97_v1 = vmul.f32 2.0, %v96_v0  ;;  %s107_s24 = int_to_ptr.vmem [resolvable:$true] %s106_s24 }
  0x2c   : > { %s208_s26 = scalar_lea.vmem %s107_s24, 128  ;;  %p215_p9 = scmp.lt.s32.totalorder %s107_s24, %s107_s24 }
  0x2d   : > { %98 = vst [vmem:[#allocation5] sm:$0xff] %v97_v1  ;;  %p209_p3 = scmp.ne.s32.totalorder %s107_s24, %s208_s26  ;;  %p216_p10 = scmp.lt.s32.totalorder %s208_s26, %s208_s26 }
  0x2f   : > { %p210_p5 = pnand %p209_p3, %p312_p2  ;;  %p217_p11 = por %p216_p10, %p215_p9 }
  0x31   : > { %p211_p7 = pneg %p210_p5 }
  0x33   : > { %p218_p12 = pnand %p217_p11, %p211_p7 }
  0x35   : > { %221 = shalt.err (!%p218_p12)
}
  0x36   : > { %s222_s29 = scalar_lea.hbm %s342_s1, 128 }
  0x37   : > { %p223_p13 = scmp.ne.s32.totalorder %s342_s1, %s222_s29  ;;  %p228_p4 = scmp.lt.u32.totalorder %s222_s29, %s342_s1 }
  0x39   : > { %p224_p0 = pnand %p223_p13, %p312_p2 }
  0x3b   : > { %p225_p1 = pneg %p224_p0 }
  0x3d   : > { %p230_p6 = pnand %p228_p4, %p225_p1 }
  0x3f   : > { %233 = shalt.err (!%p230_p6)
}
  0x40   : > { %159 = dma.vmem_to_hbm [thread:$0]  (%p312_p2), %s107_s24, 128, %s342_s1, [#allocation4]  }
  0x41   : > { %243 = dma.done.wait (%p312_p2), [#allocation4], 128  }
  0x42   : > { %245 = vsyncadd (%p312_p2), [#allocation4], 4294967168 }
  0x43 PF: > { %s13_s6 = sadd.s32 1, %s248_s6  }
  0x44   : > { %p10_p8 = scmp.ge.s32.totalorder %s13_s6, 4  }
  0x46   :  { %12 = sbr.rel (!%p10_p8) target bundleno = 2 (0x2), region = 53 }
  0x4d   :  { %119 = vsyncpa [#allocation3], 1 }
  0x4e   :  { %121 = vsyncpa [#allocation3 + $0x1], 1 }
  0x4f   :  { %122 = vsyncpa [#allocation4], 1 }
  0x50   :  { %124 = vsyncpa [#allocation4 + $0x1], 1 }

// kernel: tpu_custom_call.1
= control target key start
LH: loop header
LB: loop body
LE: loop exit
PB: predicated region body
PF: predicated region fallthrough
CT: control target
= control target key end

     0   :  { %s2578_s0 = inlined_call_operand.hbm [shape: f32[2,16,32], index: 0, kind: input, shape index: {}]   ;;  %s2579_s1 = inlined_call_operand.hbm [shape: f32[16,8], index: 1, kind: input, shape index: {}]   ;;  %s2580_s2 = inlined_call_operand.hbm [shape: f32[16,8], index: 2, kind: input, shape index: {}]   ;;  %s2581_s3 = inlined_call_operand.hbm [shape: f32[1,32], index: 3, kind: input, shape index: {}]   ;;  %s2582_s4 = inlined_call_operand.hbm [shape: bf16[32,96], index: 4, kind: input, shape index: {}]   ;;  %s2583_s5 = inlined_call_operand.hbm [shape: bf16[2,4,16,8], index: 5, kind: output, shape index: {0}]   ;;  %s2584_s6 = inlined_call_operand.hbm [shape: bf16[2,4,16,8], index: 6, kind: output, shape index: {1}]   ;;  %s2585_s7 = inlined_call_operand.hbm [shape: bf16[2,4,16,8], index: 7, kind: output, shape index: {2}]  }
   0x1   :  { %2595 = sst [smem:[#allocation22_spill]] %s2585_s7 }
   0x2   :  { %13 = vsyncpa [#allocation3], 0 }
   0x3   :  { %15 = vsyncpa [#allocation3 + $0x1], 0 }
   0x4   :  { %16 = vsyncpa [#allocation6], 0 }
   0x5   :  { %17 = vsyncpa [#allocation9], 0 }
   0x6   :  { %18 = vsyncpa [#allocation4], 0 }
   0x7   :  { %20 = vsyncpa [#allocation4 + $0x1], 0 }
   0x8   :  { %21 = vsyncpa [#allocation13], 0 }
   0x9   :  { %23 = vsyncpa [#allocation13 + $0x1], 0  ;;  %s1864_s24 = smov 0   ;;  %s1866_s25 = smov 0  }
   0xa   :  { %s1868_s26 = smov 0   ;;  %s1870_s27 = smov 0  }
   0xb   :  { %s1872_s28 = smov 0   ;;  %s1874_s29 = smov 0  }
   0xc LB: > { %2596 = sst [smem:[#allocation20_spill]] %s1764_s24  ;;  %s1895_s30 = sadd.s32 4294967295, %s1784_s29   ;;  %s1784_s29 = sphi %s1874_s29, %s29_s29   ;;  %s1780_s28 = sphi %s1872_s28, %s2624_s28   ;;  %s1776_s27 = sphi %s1870_s27, %s2623_s27   ;;  %s1772_s26 = sphi %s1868_s26, %s2622_s26   ;;  %s1768_s25 = sphi %s1866_s25, %s2621_s25   ;;  %s1764_s24 = sphi %s1864_s24, %s2620_s24  }
   0xd   : > { %s2587_s8 = sadd.s32 4294967294, %s1784_s29   ;;  %p63_p0 = scmp.ne.s32.totalorder %s1768_s25, %s1764_s24 }
   0xe   : > { %p2586_p1 = scmp.eq.s32.totalorder %s1895_s30, 0  ;;  %p189_p3 = scmp.eq.s32.totalorder %s2587_s8, 1 }
   0xf   : > { %p1241_p5 = scmp.ge.s32.totalorder %s1784_s29, 1  ;;  %p252_p7 = scmp.lt.s32.totalorder %s1784_s29, 3 }
  0x10   : > { %p1906_p4 = por %p2586_p1, %p63_p0  ;;  %p1911_p6 = por %p189_p3, %p63_p0 }
  0x11   : > { %p1916_p8 = pnand %p1241_p5, %p252_p7  ;;  %s1786_s12 = smov [#allocation5]  }
  0x12   : > { %s2597_s9 = scalar_select %p1906_p4, 1, 0 }
  0x13   : > { %s2598_s10 = scalar_select %p1911_p6, 1, 0 }
  0x14   : > { %s2600_s11 = scalar_select %p1916_p8, 1, 0 }
  0x15   : > { %2599 = sst [smem:[#allocation21_spill]] %s2598_s10  ;;  %s267_s13 = sshll.u32 %s1786_s12, 4  ;;  %s1920_s13 = int_to_ptr.vmem [resolvable:$true] %s267_s13 }
  0x16   : > { %p1367_p9 = pneg %p1916_p8  ;;  %s1787_s15 = smov [#allocation8]  }
  0x17   : > { %s297_s16 = sshll.u32 %s1787_s15, 4  ;;  %s1788_s17 = smov [#allocation7]   ;;  %s1931_s16 = int_to_ptr.vmem [resolvable:$true] %s297_s16 }
  0x18   : > { %p1927_p11 = pnand %p1367_p9, %p2586_p1  ;;  %s1933_s18 = sshll.u32 %s1788_s17, 4  ;;  %s284_s18 = int_to_ptr.vmem [resolvable:$true] %s1933_s18 }
  0x19   : > { %s1492_s21 = scalar_lea.hbm %s2579_s1, 256 }
  0x1a   : > { %p1493_p12 = scmp.ne.s32.totalorder %s2579_s1, %s1492_s21  ;;  %p1943_p13 = pneg %p1927_p11 }
  0x1b   : > { %p1499_p5 = scmp.lt.u32.totalorder %s1492_s21, %s2579_s1 }
  0x1c   : > { %p1495_p0 = pnand %p1943_p13, %p1493_p12 }
  0x1e   : > { %p1496_p3 = pneg %p1495_p0 }
  0x20   : > { %p1501_p7 = pnand %p1499_p5, %p1496_p3 }
  0x22   : > { %1504 = shalt.err (!%p1501_p7)
}
  0x23   : > { %s1505_s19 = scalar_lea.vmem %s1920_s13, 256  ;;  %p1513_p2 = scmp.lt.s32.totalorder %s1920_s13, %s1920_s13 }
  0x24   : > { %p1506_p9 = scmp.ne.s32.totalorder %s1920_s13, %s1505_s19  ;;  %p1514_p6 = scmp.lt.s32.totalorder %s1505_s19, %s1505_s19 }
  0x26   : > { %p1508_p10 = pnand %p1506_p9, %p1943_p13  ;;  %p1515_p12 = por %p1514_p6, %p1513_p2 }
  0x28   : > { %p1509_p1 = pneg %p1508_p10 }
  0x2a   : > { %p1516_p0 = pnand %p1515_p12, %p1509_p1 }
  0x2c   : > { %1519 = shalt.err (!%p1516_p0)
}
  0x2d   : > { %s1789_s20 = smov 128   ;;  %s1790_s21 = smov 8  }
  0x2e   : > { %1370 = dma.hbm_to_vmem [thread:$0]  (!%p1927_p11), %s2579_s1, 256, %s1920_s13, [#allocation6], %s1789_s20, %s1789_s20, %s1790_s21  }
  0x2f   : > { %s1520_s19 = scalar_lea.hbm %s2581_s3, 16 }
  0x30   : > { %p1521_p1 = scmp.ne.s32.totalorder %s2581_s3, %s1520_s19  ;;  %p1527_p10 = scmp.lt.u32.totalorder %s1520_s19, %s2581_s3 }
  0x32   : > { %p1523_p2 = pnand %p1521_p1, %p1943_p13 }
  0x34   : > { %p1524_p6 = pneg %p1523_p2 }
  0x36   : > { %p1529_p3 = pnand %p1527_p10, %p1524_p6 }
  0x38   : > { %1532 = shalt.err (!%p1529_p3)
}
  0x39   : > { %s1533_s13 = scalar_lea.vmem %s1931_s16, 16  ;;  %s1540_s8 = scalar_lea.vmem %s1931_s16, 32 }
  0x3a   : > { %p1534_p5 = scmp.ne.s32.totalorder %s1931_s16, %s1533_s13  ;;  %p1541_p12 = scmp.lt.s32.totalorder %s1931_s16, %s1931_s16 }
  0x3b   : > { %p1542_p0 = scmp.lt.s32.totalorder %s1540_s8, %s1533_s13 }
  0x3c   : > { %p1536_p7 = pnand %p1534_p5, %p1943_p13 }
  0x3d   : > { %p1543_p1 = por %p1542_p0, %p1541_p12 }
  0x3e   : > { %p1537_p9 = pneg %p1536_p7 }
  0x40   : > { %p1544_p2 = pnand %p1543_p1, %p1537_p9 }
  0x42   : > { %1547 = shalt.err (!%p1544_p2)
}
  0x43   : > { %1376 = dma.hbm_to_vmem [thread:$0]  (!%p1927_p11), %s2581_s3, 16, %s1931_s16, [#allocation9]  }
  0x44   : > { %s1548_s23 = scalar_lea.hbm %s2580_s2, 256 }
  0x45   : > { %p1549_p6 = scmp.ne.s32.totalorder %s2580_s2, %s1548_s23  ;;  %p1555_p5 = scmp.lt.u32.totalorder %s1548_s23, %s2580_s2 }
  0x47   : > { %p1551_p10 = pnand %p1549_p6, %p1943_p13 }
  0x49   : > { %p1552_p3 = pneg %p1551_p10 }
  0x4b   : > { %p1557_p7 = pnand %p1555_p5, %p1552_p3 }
  0x4d   : > { %1560 = shalt.err (!%p1557_p7)
}
  0x4e   : > { %s1561_s8 = scalar_lea.vmem %s284_s18, 256  ;;  %p1569_p1 = scmp.lt.s32.totalorder %s284_s18, %s284_s18 }
  0x4f   : > { %p1562_p9 = scmp.ne.s32.totalorder %s284_s18, %s1561_s8  ;;  %p1570_p2 = scmp.lt.s32.totalorder %s1561_s8, %s1561_s8 }
  0x51   : > { %p1564_p12 = pnand %p1562_p9, %p1943_p13  ;;  %p1571_p4 = por %p1570_p2, %p1569_p1 }
  0x53   : > { %p1565_p0 = pneg %p1564_p12 }
  0x55   : > { %p1572_p8 = pnand %p1571_p4, %p1565_p0 }
  0x57   : > { %1575 = shalt.err (!%p1572_p8)
}
  0x58   : > { %1373 = dma.hbm_to_vmem [thread:$0]  (!%p1927_p11), %s2580_s2, 256, %s284_s18, [#allocation6], %s1789_s20, %s1789_s20, %s1790_s21  }
  0x59   : > { %s1791_s24 = smov [#allocation10]   ;;  %s1576_s15 = scalar_lea.hbm %s2582_s4, 256 }
  0x5a   : > { %s307_s10 = sshll.u32 %s1791_s24, 4  ;;  %p1577_p4 = scmp.ne.s32.totalorder %s2582_s4, %s1576_s15  ;;  %s308_s10 = int_to_ptr.vmem [resolvable:$true] %s307_s10 }
  0x5b   : > { %p1583_p10 = scmp.lt.u32.totalorder %s1576_s15, %s2582_s4 }
  0x5c   : > { %p1579_p8 = pnand %p1577_p4, %p1943_p13 }
  0x5e   : > { %p1580_p6 = pneg %p1579_p8 }
  0x60   : > { %p1585_p3 = pnand %p1583_p10, %p1580_p6 }
  0x62   : > { %1588 = shalt.err (!%p1585_p3)
}
  0x63   : > { %s1589_s18 = scalar_lea.vmem %s308_s10, 256  ;;  %p1597_p12 = scmp.lt.s32.totalorder %s308_s10, %s308_s10 }
  0x64   : > { %p1590_p5 = scmp.ne.s32.totalorder %s308_s10, %s1589_s18  ;;  %p1598_p0 = scmp.lt.s32.totalorder %s1589_s18, %s1589_s18 }
  0x66   : > { %p1592_p7 = pnand %p1590_p5, %p1943_p13  ;;  %p1599_p1 = por %p1598_p0, %p1597_p12 }
  0x68   : > { %p1593_p9 = pneg %p1592_p7 }
  0x6a   : > { %p1600_p2 = pnand %p1599_p1, %p1593_p9 }
  0x6c   : > { %1603 = shalt.err (!%p1600_p2)
}
  0x6d   : > { %s1792_s16 = smov 64   ;;  %s1793_s12 = smov 4  }
  0x6e   : > { %1379 = dma.hbm_to_vmem [thread:$0]  (!%p1927_p11), %s2582_s4, 256, %s308_s10, [#allocation9], %s1792_s16, %s1792_s16, %s1793_s12  }
  0x6f   : > { %s41_s22 = sadd.s32 1, %s1780_s28  ;;  %s50_s23 = sadd.s32 1, %s1772_s26 }
  0x70   : > { %p43_p13 = scmp.ge.s32.totalorder %s41_s22, 2  ;;  %p57_p4 = scmp.ne.s32.totalorder %s1772_s26, %s1768_s25 }
  0x71   : > { %p58_p8 = scmp.eq.s32.totalorder %s1784_s29, 0  ;;  %p1398_p6 = scmp.lt.s32.totalorder %s1784_s29, 2 }
  0x72   : > { %s2626_s22 = smov (%p43_p13, %s41_s22), 0  ;;  %p2603_p3 = scmp.eq.s32.totalorder %s1895_s30, 1 }
  0x73   : > { %p59_p10 = por %p58_p8, %p57_p4  ;;  %s45_s14 = ssub.s32 %s1780_s28, %s2626_s22 }
  0x74   : > { %p2041_p5 = por %p2603_p3, %p57_p4  ;;  %s321_s17 = sand.u32 1, %s1772_s26  }
  0x75   : > { %p48_p7 = scmp.eq.s32.totalorder %s45_s14, 0  ;;  %s1247_s10 = sshll.u32 %s321_s17, 4 }
  0x76   : > { %s1310_s19 = sshll.u32 %s1780_s28, 8  ;;  %s325_s12 = scalar_lea.vmem [#allocation2], %s1247_s10 }
  0x77   : > { %s2050_s13 = scalar_select %p48_p7, %s1772_s26, %s50_s23  }
  0x78   : > { %s2055_s16 = scalar_lea.hbm %s2578_s0, %s1310_s19  ;;  %s334_s7 = sshll.u32 %s325_s12, 4  ;;  %s2063_s7 = int_to_ptr.vmem [resolvable:$true] %s334_s7 }
  0x79   : > { %p2059_p11 = pnand %p1398_p6, %p59_p10  ;;  %s2065_s23 = scalar_lea.sflag [#allocation3], %s321_s17 }
  0x7a   : > { %s1604_s14 = scalar_lea.hbm %s2055_s16, 256  ;;  %s1609_s8 = scalar_lea.hbm %s2578_s0, 512 }
  0x7b   : > { %p1605_p9 = scmp.ne.s32.totalorder %s2055_s16, %s1604_s14  ;;  %p1606_p12 = pneg %p2059_p11 }
  0x7c   : > { %p1610_p2 = scmp.lt.u32.totalorder %s2055_s16, %s2578_s0  ;;  %p1611_p13 = scmp.lt.u32.totalorder %s1609_s8, %s1604_s14 }
  0x7d   : > { %p1607_p0 = pnand %p1606_p12, %p1605_p9  ;;  %p1613_p8 = scmp.lt.u32.totalorder %s1604_s14, %s2055_s16 }
  0x7e   : > { %p1612_p4 = por %p1611_p13, %p1610_p2 }
  0x7f   : > { %p1608_p1 = pneg %p1607_p0 }
  0x80   : > { %p1614_p6 = por %p1613_p8, %p1612_p4 }
  0x82   : > { %p1615_p10 = pnand %p1614_p6, %p1608_p1 }
  0x84   : > { %1618 = shalt.err (!%p1615_p10)
}
  0x85   : > { %s1619_s17 = scalar_lea.vmem %s2063_s7, 256  ;;  %s1794_s10 = smov [#allocation2]  }
  0x86   : > { %p1620_p3 = scmp.ne.s32.totalorder %s2063_s7, %s1619_s17  ;;  %s1624_s19 = sshll.u32 %s1794_s10, 4  ;;  %s1625_s19 = int_to_ptr.vmem [resolvable:$false] %s1624_s19 }
  0x87   : > { %s1626_s18 = scalar_lea.vmem %s1625_s19, 512  ;;  %p1627_p0 = scmp.lt.s32.totalorder %s2063_s7, %s1625_s19 }
  0x88   : > { %p1622_p7 = pnand %p1620_p3, %p1606_p12  ;;  %p1628_p2 = scmp.lt.s32.totalorder %s1626_s18, %s1619_s17 }
  0x8a   : > { %p1623_p9 = pneg %p1622_p7  ;;  %p1629_p13 = por %p1628_p2, %p1627_p0 }
  0x8c   : > { %p1630_p4 = pnand %p1629_p13, %p1623_p9 }
  0x8e   : > { %1633 = shalt.err (!%p1630_p4)
}
  0x8f   : > { %1383 = dma.hbm_to_vmem [thread:$0]  (!%p2059_p11), %s2055_s16, 256, %s2063_s7, %s2065_s23, %s1789_s20, %s1789_s20, %s1790_s21  }
  0x90   : > { %p2606_p12 = scmp.ne.s32.totalorder %s2600_s11, 0 }
  0x91   : > { %s2099_s14 = sand.u32 (!%p2606_p12), 1, %s1768_s25   ;;  %p2607_p1 = scmp.ne.s32.totalorder (!%p2606_p12), %s2597_s9, 0 }
  0x92   : > { %346 = sbr.rel (%p2606_p12) target bundleno = 1212 (0x4bc), region = 40  ;;  %s1251_s8 = sshll.u32 (!%p2606_p12), %s2099_s14, 4 }
  0x93   : > { %s349_s12 = scalar_lea.sflag (!%p2606_p12), [#allocation3], %s2099_s14  ;;  %s352_s17 = scalar_lea.vmem (!%p2606_p12), [#allocation2], %s1251_s8 }
  0x99   : > { %1743 = dma.done.wait (%p2607_p1), %s349_s12, 256  }
  0x9a   : > { %1745 = vsyncadd (%p2607_p1), %s349_s12, 4294967040  ;;  %p2608_p8 = scmp.eq.s32.totalorder %s1895_s30, 0 }
  0x9c   : > { %1747 = dma.done.wait (%p2608_p8), [#allocation6], 512   ;;  %p2609_p11 = pmov %p2608_p8 }
  0x9d   : > { %p2610_p6 = pmov %p2608_p8 }
  0x9e   : > { %1749 = vsyncadd (%p2609_p11), [#allocation6], 4294966784 }
  0x9f   : > { %1751 = dma.done.wait (%p2610_p6), [#allocation9], 272   ;;  %p2611_p10 = pmov %p2610_p6 }
  0xa0   : > { %v416_v0 = vld [vmem:[%s352_s17] sm:$0xff]  ;;  %vm420_vm0 = vcmask 261120   ;;  %v417_v1 = vld [vmem:[%s352_s17 + $0x8] sm:$0xff]  ;;  %v1795_v7 = vmov 0.0   ;;  %vm1796_vm1 = vmmov 0   ;;  %s1797_s9 = smov 88   ;;  %v510_v38 = vlaneseq }
  0xa1   : > { %1753 = vsyncadd (%p2611_p10), [#allocation9], 4294967024  ;;  %v418_v2 = vmul.f32 %v416_v0, %v416_v0  ;;  %v419_v3 = vmul.f32 %v417_v1, %v417_v1  ;;  %v1486_v6 = vld [vmem:[#allocation10] sm:$0xff]   ;;  %1335 = vmatprep.subr.bf16.mxu0 %v1795_v7  ;;  %1339 = vmatprep.mubr.msk.bf16.mxu0 %vm1796_vm1, %v1795_v7  ;;  %v1487_v8 = vld [vmem:[#allocation10 + $0x8] sm:$0xff]   ;;  %s1798_s11 = smov 96   ;;  %s1799_s20 = smov 80  }
  0xa2   : > { %1336 = vmatpush3.bf16.msra.mxu0 %v1486_v6  ;;  %v1259_v18 = vld [vmem:[#allocation8] ss:$0 sm:$0xff]  ;;  %s1800_s21 = smov 120   ;;  %s1801_s16 = smov 72   ;;  %v511_v41 = vand.u32 127, %v510_v38  ;;  %v508_v45 = vld [vmem:[#allocation7] sm:$0xff] }
  0xa3   : > { %v421_v4 = vsel %vm420_vm0, %v418_v2, 0.0  ;;  %v424_v5 = vsel %vm420_vm0, %v419_v3, 0.0  ;;  %1337 = vmatprep.subr.bf16.mxu0 %v1795_v7  ;;  %s1802_s7 = smov 112   ;;  %s1803_s24 = smov 104   ;;  %v1805_v46 = vmov 1.0   ;;  %v509_v48 = vld [vmem:[#allocation7 + $0x8] sm:$0xff] }
  0xa4   : > { %422 = vadd.xlane.f32.xlu0 %v421_v4  ;;  %s1804_s23 = smov 8   ;;  %vm512_vm2 = vcmp.lt.s32.totalorder %v511_v41, 4  ;;  %s1806_s10 = smov 4   ;;  %vm520_vm3 = vcmask 1047616   ;;  %vm561_vm4 = vcmask 60416  }
  0xa5   : > { %v513_v47 = vsel %vm512_vm2, -1.0, %v1805_v46  ;;  %s1807_s19 = smov 32   ;;  %s2593_s18 = smov 40  }
  0xa6   : > { %1338 = vmatpush3.bf16.msra.mxu0 %v1487_v8  ;;  %v514_v49 = vmul.f32 %v513_v47, %v508_v45  ;;  %v515_v50 = vmul.f32 %v513_v47, %v509_v48  ;;  %s1809_s8 = smov 48   ;;  %s1810_s12 = smov 56  }
  0xa7   : > { %s1811_s17 = smov 16  }
  0xa8   : > { %425 = vadd.xlane.f32.xlu0 %v424_v5 }
 0x131   : > { %v423_v9 = vpop.xlane.xlu0 %422 }
 0x132   : > { %v428_v10 = vmul.f32 0.03125, %v423_v9 }
 0x134   : > { %v430_v11 = vadd.f32 1e-05, %v428_v10 }
 0x135   : > { %v426_v12 = vpop.xlane.xlu0 %425 }
 0x136   : > { %1488 = vrsqrt.f32 %v430_v11  ;;  %v429_v13 = vmul.f32 0.03125, %v426_v12 }
 0x138   : > { %v431_v14 = vadd.f32 1e-05, %v429_v13 }
 0x13a   : > { %1490 = vrsqrt.f32 %v431_v14 }
 0x140   : > { %v1489_v15 = vpop.eup %1488 }
 0x141   : > { %v434_v16 = vmul.f32 %v1489_v15, %v416_v0 }
 0x143   : > { %v443_v20 = vmul.f32 %v1259_v18, %v434_v16 }
 0x144   : > { %v1491_v17 = vpop.eup %1490 }
 0x145   : > { %v435_v19 = vmul.f32 %v1491_v17, %v417_v1 }
 0x147   : > { %v444_v21 = vmul.f32 %v1259_v18, %v435_v19  ;;  %v2266_v19 = vld [vmem:[#allocation5] sm:$0xff] }
 0x149   : > { %v445_v22 = vpack.c.bf16 %v444_v21, %v443_v20  ;;  %v2268_v20 = vld [vmem:[#allocation5 + $0x8] sm:$0xff] }
 0x14b   : > { %1340 = vmatmul.mubr.msk.bf16.vlgmr.msra.gmra.mrb[0].mxu0 %vm420_vm0, %v445_v22 }
 0x21e   : > { %v2118_v23 = vpop.f32.mrb[0].mxu0 }
 0x21f   : > { %697 = vrot.lane.b32.xlu0 %v2118_v23, %s1797_s9  ;;  %576 = vrot.lane.b32.xlu1 %v2118_v23, %s1798_s11  ;;  %v1341_v24 = vpop.f32.mrb[1].mxu0  ;;  %v2148_v28 = vmul.f32 0.35355338, %v2118_v23 }
 0x220   : > { %v2124_v25 = vpop.f32.mrb[2].mxu0 }
 0x221   : > { %v2127_v26 = vmul.f32 0.35355338, %v2124_v25  ;;  %v1342_v27 = vpop.f32.mrb[3].mxu0 }
 0x223   : > { %812 = vrot.lane.b32.xlu1 %v2118_v23, %s1799_s20  ;;  %646 = vrot.lane.b32.xlu0 %v2127_v26, %s1800_s21 }
 0x227   : > { %927 = vrot.lane.b32.xlu1 %v2118_v23, %s1801_s16  ;;  %761 = vrot.lane.b32.xlu0 %v2127_v26, %s1802_s7 }
 0x22b   : > { %578 = vrot.lane.b32.xlu1 %v2124_v25, %s1798_s11  ;;  %876 = vrot.lane.b32.xlu0 %v2127_v26, %s1803_s24 }
 0x22f   : > { %699 = vrot.lane.b32.xlu1 %v2124_v25, %s1797_s9 }
 0x233   : > { %814 = vrot.lane.b32.xlu1 %v2124_v25, %s1799_s20 }
 0x237   : > { %929 = vrot.lane.b32.xlu1 %v2124_v25, %s1801_s16 }
 0x23b   : > { %644 = vrot.lane.b32.xlu1 %v2148_v28, %s1800_s21 }
 0x23f   : > { %759 = vrot.lane.b32.xlu1 %v2148_v28, %s1802_s7 }
 0x243   : > { %874 = vrot.lane.b32.xlu1 %v2148_v28, %s1803_s24 }
 0x291   : > { %v2156_v29 = vpop.permute.xlu1 %576  ;;  %v2160_v30 = vpop.permute.xlu0 %697 }
 0x292   : > { %582 = vrot.lane.b32.xlu1 %v2156_v29, %s1804_s23 }
 0x295   : > { %v2162_v31 = vpop.permute.xlu1 %812  ;;  %v2184_v36 = vpop.permute.xlu0 %646 }
 0x296   : > { %703 = vrot.lane.b32.xlu1 %v2160_v30, %s1804_s23 }
 0x299   : > { %v2166_v32 = vpop.permute.xlu1 %927  ;;  %v2196_v40 = vpop.permute.xlu0 %761 }
 0x29a   : > { %818 = vrot.lane.b32.xlu1 %v2162_v31, %s1804_s23 }
 0x29d   : > { %v2170_v33 = vpop.permute.xlu1 %578  ;;  %v2204_v43 = vpop.permute.xlu0 %876 }
 0x29e   : > { %933 = vrot.lane.b32.xlu1 %v2166_v32, %s1804_s23  ;;  %585 = vrot.lane.b32.xlu0 %v2170_v33, %s1804_s23 }
 0x2a1   : > { %v2176_v34 = vpop.permute.xlu1 %699 }
 0x2a2   : > { %706 = vrot.lane.b32.xlu0 %v2176_v34, %s1804_s23 }
 0x2a5   : > { %v2180_v35 = vpop.permute.xlu1 %814 }
 0x2a6   : > { %821 = vrot.lane.b32.xlu0 %v2180_v35, %s1804_s23 }
 0x2a9   : > { %v2186_v37 = vpop.permute.xlu1 %929 }
 0x2aa   : > { %936 = vrot.lane.b32.xlu0 %v2186_v37, %s1804_s23 }
 0x2ad   : > { %v2190_v39 = vpop.permute.xlu1 %644 }
 0x2ae   : > { %650 = vrot.lane.b32.xlu1 %v2190_v39, %s1804_s23  ;;  %653 = vrot.lane.b32.xlu0 %v2184_v36, %s1804_s23 }
 0x2b1   : > { %v2198_v42 = vpop.permute.xlu1 %759 }
 0x2b2   : > { %765 = vrot.lane.b32.xlu1 %v2198_v42, %s1804_s23  ;;  %768 = vrot.lane.b32.xlu0 %v2196_v40, %s1804_s23 }
 0x2b5   : > { %v2206_v44 = vpop.permute.xlu1 %874 }
 0x2b6   : > { %880 = vrot.lane.b32.xlu1 %v2206_v44, %s1804_s23  ;;  %883 = vrot.lane.b32.xlu0 %v2204_v43, %s1804_s23 }
 0x2ba   : > { %521 = vrot.lane.b32.xlu1 %v2148_v28, %s1804_s23  ;;  %524 = vrot.lane.b32.xlu0 %v2127_v26, %s1804_s23 }
 0x2be   : > { %535 = vrot.lane.b32.xlu1 %v514_v49, %s1806_s10  ;;  %537 = vrot.lane.b32.xlu0 %v515_v50, %s1806_s10 }
 0x304   : > { %v583_v51 = vpop.permute.xlu1 %582 }
 0x305   : > { %v584_v52 = vsel %vm520_vm3, %v583_v51, %v2156_v29 }
 0x306   : > { %588 = vrot.lane.b32.xlu1 %v584_v52, %s1804_s23 }
 0x308   : > { %v704_v53 = vpop.permute.xlu1 %703 }
 0x309   : > { %v705_v54 = vsel %vm520_vm3, %v704_v53, %v2160_v30 }
 0x30a   : > { %709 = vrot.lane.b32.xlu1 %v705_v54, %s1804_s23 }
 0x30c   : > { %v819_v55 = vpop.permute.xlu1 %818 }
 0x30d   : > { %v820_v56 = vsel %vm520_vm3, %v819_v55, %v2162_v31 }
 0x30e   : > { %824 = vrot.lane.b32.xlu1 %v820_v56, %s1804_s23 }
 0x310   : > { %v934_v57 = vpop.permute.xlu1 %933  ;;  %v586_v58 = vpop.permute.xlu0 %585 }
 0x311   : > { %v935_v59 = vsel %vm520_vm3, %v934_v57, %v2166_v32  ;;  %v587_v60 = vsel %vm520_vm3, %v586_v58, %v2170_v33 }
 0x312   : > { %939 = vrot.lane.b32.xlu1 %v935_v59, %s1804_s23  ;;  %590 = vrot.lane.b32.xlu0 %v587_v60, %s1804_s23 }
 0x314   : > { %v707_v61 = vpop.permute.xlu0 %706 }
 0x315   : > { %v708_v62 = vsel %vm520_vm3, %v707_v61, %v2176_v34 }
 0x316   : > { %711 = vrot.lane.b32.xlu0 %v708_v62, %s1804_s23 }
 0x318   : > { %v822_v63 = vpop.permute.xlu0 %821 }
 0x319   : > { %v823_v0 = vsel %vm520_vm3, %v822_v63, %v2180_v35 }
 0x31a   : > { %826 = vrot.lane.b32.xlu0 %v823_v0, %s1804_s23 }
 0x31c   : > { %v937_v1 = vpop.permute.xlu0 %936 }
 0x31d   : > { %v938_v2 = vsel %vm520_vm3, %v937_v1, %v2186_v37 }
 0x31e   : > { %941 = vrot.lane.b32.xlu0 %v938_v2, %s1804_s23 }
 0x320   : > { %v651_v3 = vpop.permute.xlu1 %650  ;;  %v654_v4 = vpop.permute.xlu0 %653 }
 0x321   : > { %v652_v5 = vsel %vm520_vm3, %v651_v3, %v2190_v39  ;;  %v655_v6 = vsel %vm520_vm3, %v654_v4, %v2184_v36 }
 0x322   : > { %656 = vrot.lane.b32.xlu1 %v652_v5, %s1804_s23  ;;  %658 = vrot.lane.b32.xlu0 %v655_v6, %s1804_s23 }
 0x324   : > { %v766_v7 = vpop.permute.xlu1 %765  ;;  %v769_v8 = vpop.permute.xlu0 %768 }
 0x325   : > { %v767_v9 = vsel %vm520_vm3, %v766_v7, %v2198_v42  ;;  %v770_v10 = vsel %vm520_vm3, %v769_v8, %v2196_v40 }
 0x326   : > { %771 = vrot.lane.b32.xlu1 %v767_v9, %s1804_s23  ;;  %773 = vrot.lane.b32.xlu0 %v770_v10, %s1804_s23 }
 0x328   : > { %v881_v11 = vpop.permute.xlu1 %880  ;;  %v884_v12 = vpop.permute.xlu0 %883 }
 0x329   : > { %v882_v13 = vsel %vm520_vm3, %v881_v11, %v2206_v44  ;;  %v885_v14 = vsel %vm520_vm3, %v884_v12, %v2204_v43  ;;  %v2342_v12 = vpack.c.bf16 %v2124_v25, %v2124_v25 }
 0x32a   : > { %886 = vrot.lane.b32.xlu1 %v882_v13, %s1804_s23  ;;  %888 = vrot.lane.b32.xlu0 %v885_v14, %s1804_s23 }
 0x32c   : > { %v522_v15 = vpop.permute.xlu1 %521  ;;  %v525_v16 = vpop.permute.xlu0 %524 }
 0x32d   : > { %v523_v17 = vsel %vm520_vm3, %v522_v15, %v2148_v28  ;;  %v526_v18 = vsel %vm520_vm3, %v525_v16, %v2127_v26 }
 0x32e   : > { %527 = vrot.lane.b32.xlu1 %v523_v17, %s1804_s23  ;;  %529 = vrot.lane.b32.xlu0 %v526_v18, %s1804_s23 }
 0x330   : > { %v2292_v21 = vpop.permute.xlu1 %535  ;;  %v538_v46 = vpop.permute.xlu0 %537 }
 0x332   : > { %566 = vrot.lane.b32.xlu1 %v2266_v19, %s1807_s19  ;;  %568 = vrot.lane.b32.xlu0 %v2268_v20, %s1807_s19  ;;  %s1812_s19 = smov 24  }
 0x336   : > { %689 = vrot.lane.b32.xlu1 %v2266_v19, %s2593_s18  ;;  %691 = vrot.lane.b32.xlu0 %v2268_v20, %s2593_s18  ;;  %s1813_s18 = smov 28  }
 0x33a   : > { %804 = vrot.lane.b32.xlu1 %v2266_v19, %s1809_s8  ;;  %806 = vrot.lane.b32.xlu0 %v2268_v20, %s1809_s8 }
 0x33e   : > { %919 = vrot.lane.b32.xlu1 %v2266_v19, %s1810_s12  ;;  %921 = vrot.lane.b32.xlu0 %v2268_v20, %s1810_s12 }
 0x342   : > { %634 = vrot.lane.b32.xlu1 %v2266_v19, %s1804_s23  ;;  %636 = vrot.lane.b32.xlu0 %v2268_v20, %s1804_s23  ;;  %s1814_s23 = smov 36  }
 0x346   : > { %751 = vrot.lane.b32.xlu1 %v2266_v19, %s1811_s17  ;;  %753 = vrot.lane.b32.xlu0 %v2268_v20, %s1811_s17  ;;  %s1815_s17 = smov 44  }
 0x34a   : > { %866 = vrot.lane.b32.xlu1 %v2266_v19, %s1812_s19  ;;  %868 = vrot.lane.b32.xlu0 %v2268_v20, %s1812_s19  ;;  %s1816_s19 = smov 52  }
 0x378   : > { %v589_v22 = vpop.permute.xlu1 %588 }
 0x379   : > { %v592_v24 = vsel %vm520_vm3, %v589_v22, %v2156_v29 }
 0x37a   : > { %v594_v27 = vmul.f32 %v592_v24, %v2292_v21 }
 0x37c   : > { %598 = vrot.lane.b32.xlu1 %v594_v27, %s1813_s18  ;;  %v710_v38 = vpop.permute.xlu1 %709 }
 0x37d   : > { %v713_v41 = vsel %vm520_vm3, %v710_v38, %v2160_v30 }
 0x37e   : > { %v715_v45 = vmul.f32 %v713_v41, %v2292_v21 }
 0x380   : > { %719 = vrot.lane.b32.xlu1 %v715_v45, %s1814_s23  ;;  %v825_v47 = vpop.permute.xlu1 %824 }
 0x381   : > { %v828_v48 = vsel %vm520_vm3, %v825_v47, %v2162_v31 }
 0x382   : > { %v830_v49 = vmul.f32 %v828_v48, %v2292_v21 }
 0x384   : > { %834 = vrot.lane.b32.xlu1 %v830_v49, %s1815_s17  ;;  %v940_v29 = vpop.permute.xlu1 %939  ;;  %v591_v50 = vpop.permute.xlu0 %590 }
 0x385   : > { %v943_v51 = vsel %vm520_vm3, %v940_v29, %v2166_v32  ;;  %v593_v30 = vsel %vm520_vm3, %v591_v50, %v2170_v33 }
 0x386   : > { %v945_v52 = vmul.f32 %v943_v51, %v2292_v21  ;;  %v595_v53 = vmul.f32 %v593_v30, %v538_v46 }
 0x388   : > { %949 = vrot.lane.b32.xlu1 %v945_v52, %s1816_s19  ;;  %600 = vrot.lane.b32.xlu0 %v595_v53, %s1813_s18  ;;  %v712_v54 = vpop.permute.xlu0 %711  ;;  %s1817_s18 = smov 12  }
 0x389   : > { %v714_v31 = vsel %vm520_vm3, %v712_v54, %v2176_v34 }
 0x38a   : > { %v716_v55 = vmul.f32 %v714_v31, %v538_v46 }
 0x38c   : > { %721 = vrot.lane.b32.xlu0 %v716_v55, %s1814_s23  ;;  %v827_v56 = vpop.permute.xlu0 %826  ;;  %s1818_s23 = smov 20  }
 0x38d   : > { %v829_v57 = vsel %vm520_vm3, %v827_v56, %v2180_v35 }
 0x38e   : > { %v831_v32 = vmul.f32 %v829_v57, %v538_v46 }
 0x390   : > { %836 = vrot.lane.b32.xlu0 %v831_v32, %s1815_s17  ;;  %v942_v58 = vpop.permute.xlu0 %941  ;;  %s1819_s17 = smov 124  }
 0x391   : > { %v944_v33 = vsel %vm520_vm3, %v942_v58, %v2186_v37 }
 0x392   : > { %v946_v59 = vmul.f32 %v944_v33, %v538_v46 }
 0x394   : > { %v657_v60 = vpop.permute.xlu1 %656  ;;  %951 = vrot.lane.b32.xlu0 %v946_v59, %s1816_s19  ;;  %v659_v61 = vpop.permute.xlu0 %658  ;;  %s1820_s19 = smov 64  }
 0x395   : > { %v660_v62 = vsel %vm520_vm3, %v657_v60, %v2190_v39  ;;  %v661_v34 = vsel %vm520_vm3, %v659_v61, %v2184_v36 }
 0x396   : > { %v662_v63 = vmul.f32 %v660_v62, %v2292_v21  ;;  %v663_v0 = vmul.f32 %v661_v34, %v538_v46 }
 0x398   : > { %666 = vrot.lane.b32.xlu1 %v662_v63, %s1806_s10  ;;  %v772_v35 = vpop.permute.xlu1 %771  ;;  %668 = vrot.lane.b32.xlu0 %v663_v0, %s1806_s10  ;;  %v774_v1 = vpop.permute.xlu0 %773 }
 0x399   : > { %v775_v37 = vsel %vm520_vm3, %v772_v35, %v2198_v42  ;;  %v776_v2 = vsel %vm520_vm3, %v774_v1, %v2196_v40 }
 0x39a   : > { %v777_v39 = vmul.f32 %v775_v37, %v2292_v21  ;;  %v778_v3 = vmul.f32 %v776_v2, %v538_v46 }
 0x39c   : > { %781 = vrot.lane.b32.xlu1 %v777_v39, %s1817_s18  ;;  %v887_v36 = vpop.permute.xlu1 %886  ;;  %783 = vrot.lane.b32.xlu0 %v778_v3, %s1817_s18  ;;  %v889_v4 = vpop.permute.xlu0 %888 }
 0x39d   : > { %v890_v5 = vsel %vm520_vm3, %v887_v36, %v2206_v44  ;;  %v891_v6 = vsel %vm520_vm3, %v889_v4, %v2204_v43  ;;  %v2338_v43 = vpack.c.bf16 %v2118_v23, %v2118_v23 }
 0x39e   : > { %v892_v7 = vmul.f32 %v890_v5, %v2292_v21  ;;  %v893_v42 = vmul.f32 %v891_v6, %v538_v46 }
 0x3a0   : > { %896 = vrot.lane.b32.xlu1 %v892_v7, %s1818_s23  ;;  %v528_v40 = vpop.permute.xlu1 %527  ;;  %898 = vrot.lane.b32.xlu0 %v893_v42, %s1818_s23  ;;  %v530_v8 = vpop.permute.xlu0 %529 }
 0x3a1   : > { %v531_v9 = vsel %vm520_vm3, %v528_v40, %v2148_v28  ;;  %v532_v10 = vsel %vm520_vm3, %v530_v8, %v2127_v26 }
 0x3a2   : > { %v541_v11 = vmul.f32 %v2292_v21, %v531_v9  ;;  %v542_v44 = vmul.f32 %v538_v46, %v532_v10 }
 0x3a4   : > { %545 = vrot.lane.b32.xlu1 %v541_v11, %s1819_s17  ;;  %547 = vrot.lane.b32.xlu0 %v542_v44, %s1819_s17  ;;  %v567_v13 = vpop.permute.xlu1 %566  ;;  %v569_v15 = vpop.permute.xlu0 %568 }
 0x3a5   : > { %v572_v45 = vmul.f32 %v567_v13, %v2118_v23  ;;  %v573_v55 = vmul.f32 %v569_v15, %v2124_v25 }
 0x3a8   : > { %626 = vrot.lane.b32.xlu1 %v2338_v43, %s1820_s19  ;;  %628 = vrot.lane.b32.xlu0 %v2342_v12, %s1820_s19  ;;  %v690_v14 = vpop.permute.xlu1 %689  ;;  %v692_v17 = vpop.permute.xlu0 %691 }
 0x3a9   : > { %v695_v49 = vmul.f32 %v690_v14, %v2118_v23  ;;  %v696_v60 = vmul.f32 %v692_v17, %v2124_v25 }
 0x3ac   : > { %742 = vrot.lane.b32.xlu1 %v2338_v43, %s1810_s12  ;;  %744 = vrot.lane.b32.xlu0 %v2342_v12, %s1810_s12  ;;  %v805_v16 = vpop.permute.xlu1 %804  ;;  %v807_v21 = vpop.permute.xlu0 %806 }
 0x3ad   : > { %v810_v30 = vmul.f32 %v805_v16, %v2118_v23  ;;  %v811_v0 = vmul.f32 %v807_v21, %v2124_v25 }
 0x3b0   : > { %857 = vrot.lane.b32.xlu1 %v2338_v43, %s1809_s8  ;;  %859 = vrot.lane.b32.xlu0 %v2342_v12, %s1809_s8  ;;  %v920_v18 = vpop.permute.xlu1 %919  ;;  %v922_v24 = vpop.permute.xlu0 %921  ;;  %s2426_s8 = sshll.u32 %s1776_s27, 9 }
 0x3b1   : > { %v925_v56 = vmul.f32 %v920_v18, %v2118_v23  ;;  %v926_v37 = vmul.f32 %v922_v24, %v2124_v25  ;;  %s2435_s23 = scalar_lea.hbm %s2584_s6, %s2426_s8 }
 0x3b4   : > { %v635_v22 = vpop.permute.xlu1 %634  ;;  %v637_v38 = vpop.permute.xlu0 %636 }
 0x3b5   : > { %v640_v36 = vmul.f32 %v635_v22, %v2148_v28  ;;  %v641_v4 = vmul.f32 %v637_v38, %v2127_v26 }
 0x3b8   : > { %v752_v27 = vpop.permute.xlu1 %751  ;;  %v754_v48 = vpop.permute.xlu0 %753 }
 0x3b9   : > { %v757_v8 = vmul.f32 %v752_v27, %v2148_v28  ;;  %v758_v25 = vmul.f32 %v754_v48, %v2127_v26 }
 0x3bc   : > { %v867_v41 = vpop.permute.xlu1 %866  ;;  %v869_v53 = vpop.permute.xlu0 %868 }
 0x3bd   : > { %v872_v15 = vmul.f32 %v867_v41, %v2148_v28  ;;  %v873_v16 = vmul.f32 %v869_v53, %v2127_v26  ;;  %v518_v41 = vmul.f32 %v2148_v28, %v2266_v19 }
 0x3ee   : > { %v599_v46 = vpop.permute.xlu1 %598 }
 0x3ef   : > { %v604_v47 = vadd.f32 %v599_v46, %v572_v45  ;;  %v519_v46 = vmul.f32 %v2127_v26, %v2268_v20 }
 0x3f1   : > { %v1313_v29 = vpack.c.bf16 %v604_v47, %v604_v47 }
 0x3f2   : > { %v720_v50 = vpop.permute.xlu1 %719 }
 0x3f3   : > { %v725_v51 = vadd.f32 %v720_v50, %v695_v49  ;;  %612 = vrot.lane.b32.xlu1 %v1313_v29, %s1798_s11 }
 0x3f5   : > { %v1319_v52 = vpack.c.bf16 %v725_v51, %v725_v51 }
 0x3f6   : > { %v835_v54 = vpop.permute.xlu1 %834 }
 0x3f7   : > { %v840_v31 = vadd.f32 %v835_v54, %v810_v30  ;;  %733 = vrot.lane.b32.xlu1 %v1319_v52, %s1797_s9 }
 0x3f9   : > { %v1323_v57 = vpack.c.bf16 %v840_v31, %v840_v31 }
 0x3fa   : > { %v950_v32 = vpop.permute.xlu1 %949  ;;  %v601_v58 = vpop.permute.xlu0 %600 }
 0x3fb   : > { %v955_v33 = vadd.f32 %v950_v32, %v925_v56  ;;  %v605_v59 = vadd.f32 %v601_v58, %v573_v55  ;;  %848 = vrot.lane.b32.xlu1 %v1323_v57, %s1799_s20 }
 0x3fd   : > { %v1327_v61 = vpack.c.bf16 %v955_v33, %v955_v33  ;;  %v1314_v62 = vpack.c.bf16 %v605_v59, %v605_v59 }
 0x3fe   : > { %v722_v34 = vpop.permute.xlu0 %721 }
 0x3ff   : > { %v726_v63 = vadd.f32 %v722_v34, %v696_v60  ;;  %963 = vrot.lane.b32.xlu1 %v1327_v61, %s1801_s16  ;;  %614 = vrot.lane.b32.xlu0 %v1314_v62, %s1798_s11 }
 0x401   : > { %v1320_v23 = vpack.c.bf16 %v726_v63, %v726_v63 }
 0x402   : > { %v837_v35 = vpop.permute.xlu0 %836 }
 0x403   : > { %v841_v1 = vadd.f32 %v837_v35, %v811_v0  ;;  %735 = vrot.lane.b32.xlu0 %v1320_v23, %s1797_s9  ;;  %s2383_s9 = sshll.u32 %s2099_s14, 5 }
 0x404   : > { %s2392_s11 = scalar_lea.vmem [#allocation11], %s2383_s9 }
 0x405   : > { %v1324_v2 = vpack.c.bf16 %v841_v1, %v841_v1 }
 0x406   : > { %v952_v39 = vpop.permute.xlu0 %951 }
 0x407   : > { %v956_v3 = vadd.f32 %v952_v39, %v926_v37  ;;  %850 = vrot.lane.b32.xlu0 %v1324_v2, %s1799_s20  ;;  %s2399_s20 = scalar_lea.vmem [#allocation14], %s2383_s9 }
 0x409   : > { %v1328_v5 = vpack.c.bf16 %v956_v3, %v956_v3 }
 0x40a   : > { %v667_v6 = vpop.permute.xlu1 %666  ;;  %v669_v7 = vpop.permute.xlu0 %668 }
 0x40b   : > { %v672_v42 = vadd.f32 %v667_v6, %v640_v36  ;;  %v673_v40 = vadd.f32 %v669_v7, %v641_v4  ;;  %965 = vrot.lane.b32.xlu0 %v1328_v5, %s1801_s16  ;;  %s401_s16 = scalar_lea.vmem [#allocation12], %s2383_s9 }
 0x40d   : > { %v1317_v9 = vpack.c.bf16 %v672_v42, %v672_v42  ;;  %v1318_v10 = vpack.c.bf16 %v673_v40, %v673_v40 }
 0x40e   : > { %v782_v11 = vpop.permute.xlu1 %781  ;;  %v784_v44 = vpop.permute.xlu0 %783 }
 0x40f   : > { %v787_v13 = vadd.f32 %v782_v11, %v757_v8  ;;  %v788_v14 = vadd.f32 %v784_v44, %v758_v25  ;;  %680 = vrot.lane.b32.xlu1 %v1317_v9, %s1800_s21  ;;  %682 = vrot.lane.b32.xlu0 %v1318_v10, %s1800_s21  ;;  %s2612_s21 = smov 40  }
 0x411   : > { %v1321_v17 = vpack.c.bf16 %v787_v13, %v787_v13  ;;  %v1322_v18 = vpack.c.bf16 %v788_v14, %v788_v14 }
 0x412   : > { %v897_v21 = vpop.permute.xlu1 %896  ;;  %v899_v22 = vpop.permute.xlu0 %898 }
 0x413   : > { %v902_v24 = vadd.f32 %v897_v21, %v872_v15  ;;  %v903_v27 = vadd.f32 %v899_v22, %v873_v16  ;;  %795 = vrot.lane.b32.xlu1 %v1321_v17, %s1802_s7  ;;  %797 = vrot.lane.b32.xlu0 %v1322_v18, %s1802_s7  ;;  %s1025_s7 = sshll.u32 %s401_s16, 4  ;;  %s2429_s7 = int_to_ptr.vmem [resolvable:$true] %s1025_s7 }
 0x414   : > { %s1634_s27 = scalar_lea.vmem %s2429_s7, 512 }
 0x415   : > { %v1325_v38 = vpack.c.bf16 %v902_v24, %v902_v24  ;;  %v1326_v45 = vpack.c.bf16 %v903_v27, %v903_v27  ;;  %p1635_p3 = scmp.ne.s32.totalorder %s2429_s7, %s1634_s27 }
 0x416   : > { %v546_v47 = vpop.permute.xlu1 %545  ;;  %v548_v48 = vpop.permute.xlu0 %547 }
 0x417   : > { %v551_v49 = vadd.f32 %v546_v47, %v518_v41  ;;  %v552_v29 = vadd.f32 %v548_v48, %v519_v46  ;;  %910 = vrot.lane.b32.xlu1 %v1325_v38, %s1803_s24  ;;  %912 = vrot.lane.b32.xlu0 %v1326_v45, %s1803_s24  ;;  %s986_s24 = sand.u32 1, %s1895_s30   ;;  %p1636_p7 = pnand %p1635_p3, %p2041_p5 }
 0x418   : > { %s2438_s17 = scalar_lea.sflag [#allocation13], %s986_s24  ;;  %s1821_s30 = smov [#allocation12]  }
 0x419   : > { %v1311_v50 = vpack.c.bf16 %v551_v49, %v551_v49  ;;  %v1312_v51 = vpack.c.bf16 %v552_v29, %v552_v29  ;;  %p1637_p9 = pneg %p1636_p7  ;;  %s1638_s9 = sshll.u32 %s1821_s30, 4  ;;  %s1639_s9 = int_to_ptr.vmem [resolvable:$false] %s1638_s9 }
 0x41a   : > { %v627_v30 = vpop.permute.xlu1 %626  ;;  %v629_v52 = vpop.permute.xlu0 %628  ;;  %p1641_p0 = scmp.lt.s32.totalorder %s2429_s7, %s1639_s9 }
 0x41b   : > { %562 = vst.msk [vmem:[%s2392_s11] sm:$0xf] %vm561_vm4, %v1311_v50  ;;  %563 = vst.msk [vmem:[%s2392_s11 + $0x4] sm:$0xf] %vm561_vm4, %v1312_v51  ;;  %972 = vrot.lane.b32.xlu1 %v2338_v43, %s2612_s21  ;;  %974 = vrot.lane.b32.xlu0 %v2342_v12, %s2612_s21  ;;  %s1640_s21 = scalar_lea.vmem %s1639_s9, 1024 }
 0x41c   : > { %632 = vst.msk [vmem:[%s2399_s20] sm:$0xf] %vm561_vm4, %v627_v30  ;;  %633 = vst.msk [vmem:[%s2399_s20 + $0x4] sm:$0xf] %vm561_vm4, %v629_v52  ;;  %p1642_p2 = scmp.lt.s32.totalorder %s1640_s21, %s1634_s27 }
 0x41e   : > { %v743_v26 = vpop.permute.xlu1 %742  ;;  %v745_v28 = vpop.permute.xlu0 %744  ;;  %p1643_p13 = por %p1642_p2, %p1641_p0 }
 0x41f   : > { %1277 = vst.msk [vmem:[%s2399_s20 + $0x8] sm:$0xf] %vm561_vm4, %v743_v26  ;;  %1278 = vst.msk [vmem:[%s2399_s20 + $0xc] sm:$0xf] %vm561_vm4, %v745_v28 }
 0x420   : > { %p1644_p4 = pnand %p1643_p13, %p1637_p9 }
 0x422   : > { %v858_v19 = vpop.permute.xlu1 %857  ;;  %v860_v20 = vpop.permute.xlu0 %859 }
 0x423   : > { %1287 = vst.msk [vmem:[%s2399_s20 + $0x10] sm:$0xf] %vm561_vm4, %v858_v19  ;;  %1288 = vst.msk [vmem:[%s2399_s20 + $0x14] sm:$0xf] %vm561_vm4, %v860_v20 }
 0x465   : > { %v613_v53 = vpop.permute.xlu1 %612 }
 0x466   : > { %618 = vst.msk [vmem:[%s401_s16] sm:$0xf] %vm561_vm4, %v613_v53 }
 0x469   : > { %v734_v43 = vpop.permute.xlu1 %733 }
 0x46a   : > { %1275 = vst.msk [vmem:[%s401_s16 + $0x8] sm:$0xf] %vm561_vm4, %v734_v43 }
 0x46d   : > { %v849_v12 = vpop.permute.xlu1 %848 }
 0x46e   : > { %1285 = vst.msk [vmem:[%s401_s16 + $0x10] sm:$0xf] %vm561_vm4, %v849_v12 }
 0x471   : > { %v964_v54 = vpop.permute.xlu1 %963  ;;  %v615_v31 = vpop.permute.xlu0 %614 }
 0x472   : > { %1295 = vst.msk [vmem:[%s401_s16 + $0x18] sm:$0xf] %vm561_vm4, %v964_v54  ;;  %619 = vst.msk [vmem:[%s401_s16 + $0x4] sm:$0xf] %vm561_vm4, %v615_v31 }
 0x475   : > { %v736_v55 = vpop.permute.xlu0 %735 }
 0x476   : > { %1276 = vst.msk [vmem:[%s401_s16 + $0xc] sm:$0xf] %vm561_vm4, %v736_v55 }
 0x479   : > { %v851_v56 = vpop.permute.xlu0 %850 }
 0x47a   : > { %1286 = vst.msk [vmem:[%s401_s16 + $0x14] sm:$0xf] %vm561_vm4, %v851_v56 }
 0x47d   : > { %v966_v57 = vpop.permute.xlu0 %965 }
 0x47e   : > { %1296 = vst.msk [vmem:[%s401_s16 + $0x1c] sm:$0xf] %vm561_vm4, %v966_v57 }
 0x47f   : > { %1647 = shalt.err (!%p1644_p4)
}
 0x480   : > { %s1648_s16 = scalar_lea.hbm %s2435_s23, 512  ;;  %s1652_s18 = scalar_lea.hbm %s2584_s6, 1024 }
 0x481   : > { %p1649_p12 = scmp.ne.s32.totalorder %s2435_s23, %s1648_s16  ;;  %p1653_p11 = scmp.lt.u32.totalorder %s2435_s23, %s2584_s6 }
 0x482   : > { %p1654_p6 = scmp.lt.u32.totalorder %s1652_s18, %s1648_s16  ;;  %p1656_p3 = scmp.lt.u32.totalorder %s1648_s16, %s2435_s23 }
 0x483   : > { %p1650_p1 = pnand %p1649_p12, %p2041_p5 }
 0x484   : > { %p1655_p10 = por %p1654_p6, %p1653_p11 }
 0x485   : > { %p1651_p8 = pneg %p1650_p1 }
 0x486   : > { %p1657_p7 = por %p1656_p3, %p1655_p10 }
 0x488   : > { %p1658_p9 = pnand %p1657_p7, %p1651_p8 }
 0x48a   : > { %1661 = shalt.err (!%p1658_p9)
}
 0x48b   : > { %1362 = dma.vmem_to_hbm [thread:$0]  (%p2041_p5), %s2429_s7, 512, %s2435_s23, %s2438_s17, %s1820_s19, %s1820_s19, %s1806_s10   ;;  %v681_v32 = vpop.permute.xlu1 %680  ;;  %v683_v58 = vpop.permute.xlu0 %682 }
 0x48c   : > { %1271 = vst.msk [vmem:[%s2392_s11 + $0x8] sm:$0xf] %vm561_vm4, %v681_v32  ;;  %1272 = vst.msk [vmem:[%s2392_s11 + $0xc] sm:$0xf] %vm561_vm4, %v683_v58  ;;  %s1007_s27 = sshll.u32 %s2392_s11, 4  ;;  %s2478_s7 = scalar_lea.hbm %s2583_s5, %s2426_s8  ;;  %s2480_s27 = int_to_ptr.vmem [resolvable:$true] %s1007_s27 }
 0x48d   : > { %s982_s24 = scalar_lea.sflag [#allocation4], %s2099_s14  ;;  %s1662_s12 = scalar_lea.vmem %s2480_s27, 512 }
 0x48e   : > { %p1663_p0 = scmp.ne.s32.totalorder %s2480_s27, %s1662_s12  ;;  %s1822_s18 = smov [#allocation11]  }
 0x48f   : > { %v796_v33 = vpop.permute.xlu1 %795  ;;  %v798_v59 = vpop.permute.xlu0 %797  ;;  %s1666_s30 = sshll.u32 %s1822_s18, 4  ;;  %s1667_s30 = int_to_ptr.vmem [resolvable:$false] %s1666_s30 }
 0x490   : > { %1281 = vst.msk [vmem:[%s2392_s11 + $0x10] sm:$0xf] %vm561_vm4, %v796_v33  ;;  %1282 = vst.msk [vmem:[%s2392_s11 + $0x14] sm:$0xf] %vm561_vm4, %v798_v59  ;;  %p1664_p2 = pnand %p1663_p0, %p2041_p5  ;;  %s1668_s9 = scalar_lea.vmem %s1667_s30, 1024 }
 0x491   : > { %p1669_p4 = scmp.lt.s32.totalorder %s2480_s27, %s1667_s30  ;;  %p1670_p12 = scmp.lt.s32.totalorder %s1668_s9, %s1662_s12 }
 0x492   : > { %p1665_p13 = pneg %p1664_p2 }
 0x493   : > { %v911_v60 = vpop.permute.xlu1 %910  ;;  %v913_v61 = vpop.permute.xlu0 %912  ;;  %p1671_p1 = por %p1670_p12, %p1669_p4 }
 0x494   : > { %1291 = vst.msk [vmem:[%s2392_s11 + $0x18] sm:$0xf] %vm561_vm4, %v911_v60  ;;  %1292 = vst.msk [vmem:[%s2392_s11 + $0x1c] sm:$0xf] %vm561_vm4, %v913_v61 }
 0x495   : > { %p1672_p8 = pnand %p1671_p1, %p1665_p13 }
 0x497   : > { %1675 = shalt.err (!%p1672_p8)
}
 0x498   : > { %s1676_s11 = scalar_lea.hbm %s2478_s7, 512  ;;  %s1680_s18 = scalar_lea.hbm %s2583_s5, 1024 }
 0x499   : > { %p1677_p11 = scmp.ne.s32.totalorder %s2478_s7, %s1676_s11  ;;  %p1681_p3 = scmp.lt.u32.totalorder %s2478_s7, %s2583_s5 }
 0x49a   : > { %p1682_p7 = scmp.lt.u32.totalorder %s1680_s18, %s1676_s11  ;;  %p1684_p0 = scmp.lt.u32.totalorder %s1676_s11, %s2478_s7 }
 0x49b   : > { %p1678_p6 = pnand %p1677_p11, %p2041_p5 }
 0x49c   : > { %p1683_p9 = por %p1682_p7, %p1681_p3 }
 0x49d   : > { %p1679_p10 = pneg %p1678_p6 }
 0x49e   : > { %p1685_p2 = por %p1684_p0, %p1683_p9 }
 0x4a0   : > { %p1686_p13 = pnand %p1685_p2, %p1679_p10 }
 0x4a2   : > { %1689 = shalt.err (!%p1686_p13)
}
 0x4a3   : > { %1361 = dma.vmem_to_hbm [thread:$0]  (%p2041_p5), %s2480_s27, 512, %s2478_s7, %s982_s24, %s1820_s19, %s1820_s19, %s1806_s10   ;;  %v973_v62 = vpop.permute.xlu1 %972  ;;  %v975_v34 = vpop.permute.xlu0 %974 }
 0x4a4   : > { %s2613_s23 = sshll.u32 %s2399_s20, 4  ;;  %s2614_s11 = sld [smem:[#allocation22_spill]]  ;;  %1297 = vst.msk [vmem:[%s2399_s20 + $0x18] sm:$0xf] %vm561_vm4, %v973_v62  ;;  %1298 = vst.msk [vmem:[%s2399_s20 + $0x1c] sm:$0xf] %vm561_vm4, %v975_v34  ;;  %s2516_s23 = int_to_ptr.vmem [resolvable:$true] %s2613_s23 }
 0x4a5   : > { %s1690_s14 = scalar_lea.vmem %s2516_s23, 512  ;;  %s1823_s27 = smov [#allocation14]  }
 0x4a6   : > { %p1691_p4 = scmp.ne.s32.totalorder %s2516_s23, %s1690_s14  ;;  %s1694_s7 = sshll.u32 %s1823_s27, 4  ;;  %s1695_s7 = int_to_ptr.vmem [resolvable:$false] %s1694_s7 }
 0x4a7   : > { %s1696_s24 = scalar_lea.vmem %s1695_s7, 1024  ;;  %p1697_p8 = scmp.lt.s32.totalorder %s2516_s23, %s1695_s7 }
 0x4a8   : > { %p1692_p12 = pnand %p1691_p4, %p2041_p5  ;;  %p1698_p11 = scmp.lt.s32.totalorder %s1696_s24, %s1690_s14 }
 0x4aa   : > { %s2522_s21 = scalar_lea.hbm %s2614_s11, %s2426_s8  ;;  %p1693_p1 = pneg %p1692_p12 }
 0x4ab   : > { %p1699_p6 = por %p1698_p11, %p1697_p8 }
 0x4ad   : > { %p1700_p10 = pnand %p1699_p6, %p1693_p1 }
 0x4af   : > { %1703 = shalt.err (!%p1700_p10)
}
 0x4b0   : > { %s1704_s20 = scalar_lea.hbm %s2522_s21, 512  ;;  %s1708_s18 = scalar_lea.hbm %s2614_s11, 1024 }
 0x4b1   : > { %p1705_p3 = scmp.ne.s32.totalorder %s2522_s21, %s1704_s20  ;;  %p1709_p0 = scmp.lt.u32.totalorder %s2522_s21, %s2614_s11 }
 0x4b2   : > { %p1710_p2 = scmp.lt.u32.totalorder %s1708_s18, %s1704_s20  ;;  %p1712_p4 = scmp.lt.u32.totalorder %s1704_s20, %s2522_s21 }
 0x4b3   : > { %p1706_p7 = pnand %p1705_p3, %p2041_p5 }
 0x4b4   : > { %p1711_p13 = por %p1710_p2, %p1709_p0 }
 0x4b5   : > { %p1707_p9 = pneg %p1706_p7 }
 0x4b6   : > { %p1713_p12 = por %p1712_p4, %p1711_p13 }
 0x4b8   : > { %p1714_p1 = pnand %p1713_p12, %p1707_p9 }
 0x4ba   : > { %1717 = shalt.err (!%p1714_p1)
}
 0x4bb   : > { %1363 = dma.vmem_to_hbm [thread:$0]  (%p2041_p5), %s2516_s23, 512, %s2522_s21, %s2438_s17, %s1820_s19, %s1820_s19, %s1806_s10  }
 0x4bc PF: > { %s2615_s9 = sld [smem:[#allocation20_spill]]  ;;  %s2616_s14 = sld [smem:[#allocation21_spill]] }
 0x4bd   : > { %p2618_p11 = scmp.ge.s32.totalorder %s1784_s29, 2 }
 0x4c2   : > { %s1058_s27 = sand.u32 1, %s2615_s9   ;;  %p2617_p8 = scmp.ne.s32.totalorder %s2616_s14, 0 }
 0x4c3   : > { %s1059_s7 = scalar_lea.sflag [#allocation4], %s1058_s27 }
 0x4c4   : > { %p1385_p6 = pnand %p2618_p11, %p2617_p8 }
 0x4c6   : > { %1755 = dma.done.wait (!%p1385_p6), %s1059_s7, 512  }
 0x4c7   : > { %1757 = vsyncadd (!%p1385_p6), %s1059_s7, 4294966784  ;;  %s2619_s15 = sadd.s32 4294967294, %s1784_s29  }
 0x4c8   : > { %s1067_s24 = sand.u32 1, %s2619_s15  }
 0x4c9   : > { %s1068_s20 = scalar_lea.sflag [#allocation13], %s1067_s24 }
 0x4ca   : > { %1759 = dma.done.wait (!%p1385_p6), %s1068_s20, 1024  }
 0x4cb   : > { %1761 = vsyncadd (!%p1385_p6), %s1068_s20, 4294966272  ;;  %s29_s29 = sadd.s32 1, %s1784_s29   ;;  %s2620_s24 = smov %s1768_s25 }
 0x4cc   : > { %p26_p5 = scmp.ge.s32.totalorder %s29_s29, 4   ;;  %s2621_s25 = smov %s1772_s26 }
 0x4cd   : > { %s2622_s26 = smov %s2050_s13  ;;  %s2623_s27 = smov %s1780_s28 }
 0x4ce   : > { %s2624_s28 = smov %s2626_s22  ;;  %28 = sbr.rel (!%p26_p5) target bundleno = 12 (0xc), region = 144 }
 0x4d5   :  { %1082 = vsyncpa [#allocation3], 1 }
 0x4d6   :  { %1084 = vsyncpa [#allocation3 + $0x1], 1 }
 0x4d7   :  { %1085 = vsyncpa [#allocation6], 1 }
 0x4d8   :  { %1086 = vsyncpa [#allocation9], 1 }
 0x4d9   :  { %1087 = vsyncpa [#allocation4], 1 }
 0x4da   :  { %1089 = vsyncpa [#allocation4 + $0x1], 1 }
 0x4db   :  { %1090 = vsyncpa [#allocation13], 1 }
 0x4dc   :  { %1092 = vsyncpa [#allocation13 + $0x1], 1 }

</bundles_post_ra>
